<compile_context>
chip_gen: v6e
topology: v6e:2x2x1
jax: 0.10.0
libtpu: 0.0.40
codegen_flags: <defaults>
</compile_context>

<pallas_src>
import functools

import jax
import jax.numpy as jnp
import numpy as np
from jax import lax
from jax.experimental import pallas as pl
from jax.experimental.pallas import tpu as pltpu


def _cc_flash_kernel(x_m_ref, x_n_ref, wk_ref, bk_ref, wqv_ref, bqv_ref,
                     o_ref, k_sc, m_sc, l_sc, acc_sc, *, cq, cq_pad):
    ni = pl.program_id(2)

    # ---- once per (batch, m-tile): project K for this row tile, reset the
    #      online-softmax running state.
    @pl.when(ni == 0)
    def _init():
        x_m = x_m_ref[...].astype(jnp.bfloat16)                            # (bm, C)
        k = jnp.dot(x_m, wk_ref[...],
                    preferred_element_type=jnp.float32) + bk_ref[...]      # (bm, Cq)
        k_sc[...] = k
        m_sc[...] = jnp.full(m_sc.shape, -jnp.inf, jnp.float32)
        l_sc[...] = jnp.zeros(l_sc.shape, jnp.float32)
        acc_sc[...] = jnp.zeros(acc_sc.shape, jnp.float32)

    # ---- fused Q|V projection of the current n-tile: one bf16 GEMM.
    x_n = x_n_ref[...]                                                     # (bn, C) bf16
    qv = jnp.dot(x_n, wqv_ref[...],
                 preferred_element_type=jnp.float32) + bqv_ref[...]        # (bn, cq_pad+C)
    q = qv[:, :cq].astype(jnp.bfloat16)                                    # (bn, Cq)
    v = qv[:, cq_pad:].astype(jnp.bfloat16)                                # (bn, C), 128-aligned slice

    # ---- scores already transposed: s[m, n] = k[m] . q[n]   (no .T needed)
    s = lax.dot_general(k_sc[...].astype(jnp.bfloat16), q,
                        (((1,), (1,)), ((), ())),
                        preferred_element_type=jnp.float32)                # (bm, bn)

    # ---- online softmax over n (f32 elementwise), bf16 operands for P @ V.
    m_prev = m_sc[...]
    m_new = jnp.maximum(m_prev, jnp.max(s, axis=-1, keepdims=True))        # (bm, 1)
    alpha = jnp.exp(m_prev - m_new)
    p = jnp.exp(s - m_new)                                                 # (bm, bn) f32
    l_sc[...] = alpha * l_sc[...] + jnp.sum(p, axis=-1, keepdims=True)
    acc_sc[...] = alpha * acc_sc[...] + jnp.dot(
        p.astype(jnp.bfloat16), v, preferred_element_type=jnp.float32)     # (bm, C)
    m_sc[...] = m_new

    # ---- finalize: normalize with approx reciprocal, add residual, store.
    @pl.when(ni == pl.num_programs(2) - 1)
    def _fin():
        inv_l = pl.reciprocal(l_sc[...], approx=True)
        out = acc_sc[...] * inv_l + x_m_ref[...].astype(jnp.float32)
        o_ref[...] = out.astype(o_ref.dtype)


def criss_cross_attention(x_nchw, params, *, block_m=128, block_n=128):
    """x_nchw: (B, C, H, W) float32. params: PyTorch-layout 1x1-conv weights/biases."""
    B, C, H, W = x_nchw.shape
    HW = H * W
    Cq = C // 8
    wq, bq, wk, bk, wv, bv = params

    def pick(blk):
        return blk if (HW > blk and HW % blk == 0) else HW

    bm = pick(block_m)
    bn = pick(block_n)

    # NCHW -> (B, HW, C); f32 stream for residual, bf16 stream for projections.
    x_flat = jnp.transpose(x_nchw, (0, 2, 3, 1)).reshape(B, HW, C)
    x_bf16 = x_flat.astype(jnp.bfloat16)

    # 1x1 conv weight (Cout, Cin, 1, 1) -> (Cin, Cout) matmul weight.
    wq_m = wq.reshape(Cq, C).T
    wv_m = wv.reshape(C, C).T
    wk_m = wk.reshape(Cq, C).T.astype(jnp.bfloat16)
    bk_m = bk.reshape(1, Cq).astype(jnp.float32)

    # Fused Q|V weight: Q columns at [0, Cq), V columns at a 128-aligned offset
    # so the in-kernel V slice starts on a vreg boundary (no lane rotation).
    Cq_pad = ((Cq + 127) // 128) * 128
    Dqv = Cq_pad + C
    wqv = (jnp.zeros((C, Dqv), jnp.float32)
           .at[:, :Cq].set(wq_m)
           .at[:, Cq_pad:].set(wv_m)
           .astype(jnp.bfloat16))
    bqv = (jnp.zeros((1, Dqv), jnp.float32)
           .at[:, :Cq].set(bq.reshape(1, Cq))
           .at[:, Cq_pad:].set(bv.reshape(1, C)))

    grid = (B, HW // bm, HW // bn)
    kernel = functools.partial(_cc_flash_kernel, cq=Cq, cq_pad=Cq_pad)

    flops = B * (2 * HW * C * Dqv          # fused Q|V projection
                 + 2 * HW * C * Cq         # K projection
                 + 2 * HW * HW * Cq        # scores
                 + 2 * HW * HW * C)        # P @ V
    cost = pl.CostEstimate(
        flops=int(flops),
        transcendentals=int(B * HW * HW),
        bytes_accessed=int(4 * x_flat.size            # x (f32, residual + K)
                           + 2 * x_bf16.size * (HW // bm)  # bf16 n-stream per m-tile
                           + 4 * x_flat.size))        # output

    out_flat = pl.pallas_call(
        kernel,
        out_shape=jax.ShapeDtypeStruct((B, HW, C), x_nchw.dtype),
        grid=grid,
        in_specs=[
            pl.BlockSpec((None, bm, C), lambda b, mi, ni: (b, mi, 0)),  # x m-rows (f32)
            pl.BlockSpec((None, bn, C), lambda b, mi, ni: (b, ni, 0)),  # x n-rows (bf16)
            pl.BlockSpec((C, Cq), lambda b, mi, ni: (0, 0)),            # Wk
            pl.BlockSpec((1, Cq), lambda b, mi, ni: (0, 0)),            # bk
            pl.BlockSpec((C, Dqv), lambda b, mi, ni: (0, 0)),           # Wq|Wv fused
            pl.BlockSpec((1, Dqv), lambda b, mi, ni: (0, 0)),           # bq|bv fused
        ],
        out_specs=pl.BlockSpec((None, bm, C), lambda b, mi, ni: (b, mi, 0)),
        scratch_shapes=[
            pltpu.VMEM((bm, Cq), jnp.float32),   # K tile (resident across the n loop)
            pltpu.VMEM((bm, 1), jnp.float32),    # running max
            pltpu.VMEM((bm, 1), jnp.float32),    # running sum
            pltpu.VMEM((bm, C), jnp.float32),    # output accumulator
        ],
        compiler_params=pltpu.CompilerParams(
            dimension_semantics=("parallel", "parallel", "arbitrary")),
        cost_estimate=cost,
    )(x_flat, x_bf16, wk_m, bk_m, wqv, bqv)

    # (B, HW, C) -> NCHW
    return out_flat.reshape(B, H, W, C).transpose(0, 3, 1, 2)


def reference_jax(x, params):
    """Pure-JAX reference mirroring the PyTorch forward exactly (f32)."""
    B, C, H, W = x.shape
    Cq = C // 8
    wq, bq, wk, bk, wv, bv = params

    def conv1x1(x, w, b):
        return (jnp.einsum('bchw,oc->bohw', x, w.reshape(w.shape[0], C))
                + b.reshape(1, -1, 1, 1))

    q = conv1x1(x, wq, bq).reshape(B, Cq, H * W)
    k = conv1x1(x, wk, bk).reshape(B, Cq, H * W)
    v = conv1x1(x, wv, bv).reshape(B, C, H * W)
    att = jnp.einsum('bcn,bcm->bnm', q, k)
    att = jax.nn.softmax(att, axis=1)             # dim=1, i.e. the first HW axis
    out = jnp.einsum('bcn,bnm->bcm', v, att)
    return out.reshape(B, C, H, W) + x


def init_params(key, C):
    """Deterministic synthetic parameters with PyTorch Conv2d shapes."""
    Cq = C // 8
    ks = jax.random.split(key, 6)
    scale = 1.0 / np.sqrt(C)
    wq = jax.random.uniform(ks[0], (Cq, C, 1, 1), jnp.float32, -scale, scale)
    bq = jax.random.uniform(ks[1], (Cq,), jnp.float32, -scale, scale)
    wk = jax.random.uniform(ks[2], (Cq, C, 1, 1), jnp.float32, -scale, scale)
    bk = jax.random.uniform(ks[3], (Cq,), jnp.float32, -scale, scale)
    wv = jax.random.uniform(ks[4], (C, C, 1, 1), jnp.float32, -scale, scale)
    bv = jax.random.uniform(ks[5], (C,), jnp.float32, -scale, scale)
    return (wq, bq, wk, bk, wv, bv)


if __name__ == "__main__":
    B, C, H, W = 2, 16, 16, 16   # C must be >= 8 (conv_q/k produce C//8 channels)
    key = jax.random.PRNGKey(0)
    kx, kp = jax.random.split(key)
    x = jax.random.normal(kx, (B, C, H, W), dtype=jnp.float32)
    params = init_params(kp, C)

    out = jax.block_until_ready(criss_cross_attention(x, params))
    ref = jax.block_until_ready(reference_jax(x, params))

    # bf16 matmul operands + approx reciprocal loosen the tolerance vs. f32.
    np.testing.assert_allclose(np.asarray(out), np.asarray(ref),
                               rtol=3e-2, atol=3e-2)
    print("KERNEL_OK")
</pallas_src>

<mosaic_0001>
module attributes {stable_mosaic.version = 11 : i64} {
  func.func @_cc_flash_kernel(%arg0: i32, %arg1: i32, %arg2: i32, %arg3: memref<1x128x16xf32, #tpu.memory_space<vmem>>, %arg4: memref<1x128x16xbf16, #tpu.memory_space<vmem>>, %arg5: memref<16x2xbf16, #tpu.memory_space<vmem>>, %arg6: memref<1x2xf32, #tpu.memory_space<vmem>>, %arg7: memref<16x144xbf16, #tpu.memory_space<vmem>>, %arg8: memref<1x144xf32, #tpu.memory_space<vmem>>, %arg9: memref<1x128x16xf32, #tpu.memory_space<vmem>>, %arg10: memref<128x2xf32, #tpu.memory_space<vmem>>, %arg11: memref<128x1xf32, #tpu.memory_space<vmem>>, %arg12: memref<128x1xf32, #tpu.memory_space<vmem>>, %arg13: memref<128x16xf32, #tpu.memory_space<vmem>>) attributes {dimension_semantics = [#tpu.dimension_semantics<parallel>, #tpu.dimension_semantics<parallel>, #tpu.dimension_semantics<arbitrary>], iteration_bounds = array<i64: 2, 2, 2>, scalar_prefetch = 0 : i64, scratch_operands = 4 : i64, tpu.core_type = #tpu.core_type<tc>, window_params = [{transform_indices = @transform_0, window_bounds = array<i64: 1, 128, 16>}, {transform_indices = @transform_1, window_bounds = array<i64: 1, 128, 16>}, {pipeline_mode = #tpu.pipeline_mode<synchronous>, transform_indices = @transform_2, window_bounds = array<i64: 16, 2>}, {pipeline_mode = #tpu.pipeline_mode<synchronous>, transform_indices = @transform_3, window_bounds = array<i64: 1, 2>}, {pipeline_mode = #tpu.pipeline_mode<synchronous>, transform_indices = @transform_4, window_bounds = array<i64: 16, 144>}, {pipeline_mode = #tpu.pipeline_mode<synchronous>, transform_indices = @transform_5, window_bounds = array<i64: 1, 144>}, {transform_indices = @transform_6, window_bounds = array<i64: 1, 128, 16>}]} {
    %c0_i32 = arith.constant 0 : i32
    %0 = arith.cmpi eq, %arg2, %c0_i32 : i32
    %1 = arith.extui %0 : i1 to i32
    %c0_i32_0 = arith.constant 0 : i32
    %2 = arith.cmpi ne, %1, %c0_i32_0 : i32
    scf.if %2 {
      %c0_26 = arith.constant 0 : index
      %c0_27 = arith.constant 0 : index
      %c0_28 = arith.constant 0 : index
      %43 = vector.load %arg3[%c0_26, %c0_27, %c0_28] : memref<1x128x16xf32, #tpu.memory_space<vmem>>, vector<1x128x16xf32>
      %44 = vector.shape_cast %43 : vector<1x128x16xf32> to vector<128x16xf32>
      %45 = arith.truncf %44 : vector<128x16xf32> to vector<128x16xbf16>
      %c0_29 = arith.constant 0 : index
      %c0_30 = arith.constant 0 : index
      %46 = vector.load %arg5[%c0_29, %c0_30] : memref<16x2xbf16, #tpu.memory_space<vmem>>, vector<16x2xbf16>
      %cst_31 = arith.constant dense<0.000000e+00> : vector<128x2xf32>
      %47 = tpu.matmul %45, %46, %cst_31 {dimension_numbers = #tpu.dot_dimension_numbers<[1], [0], [0], [1], [0, 0, 1, 1], [], []>} : vector<128x16xbf16>, vector<16x2xbf16>, vector<128x2xf32> -> vector<128x2xf32>
      %c0_32 = arith.constant 0 : index
      %c0_33 = arith.constant 0 : index
      %48 = vector.load %arg6[%c0_32, %c0_33] : memref<1x2xf32, #tpu.memory_space<vmem>>, vector<1x2xf32>
      %49 = vector.broadcast %48 : vector<1x2xf32> to vector<128x2xf32>
      %50 = arith.addf %47, %49 : vector<128x2xf32>
      %c0_34 = arith.constant 0 : index
      %c0_35 = arith.constant 0 : index
      %51 = vector.load %arg10[%c0_34, %c0_35] : memref<128x2xf32, #tpu.memory_space<vmem>>, vector<128x2xf32>
      tpu.vector_store %arg10[%c0_34, %c0_35], %50 {strides = array<i32>} : memref<128x2xf32, #tpu.memory_space<vmem>>, vector<128x2xf32>,
      %cst_36 = arith.constant 0xFF800000 : f32
      %52 = vector.broadcast %cst_36 : f32 to vector<128x1xf32>
      %c0_37 = arith.constant 0 : index
      %c0_38 = arith.constant 0 : index
      %53 = vector.load %arg11[%c0_37, %c0_38] : memref<128x1xf32, #tpu.memory_space<vmem>>, vector<128x1xf32>
      tpu.vector_store %arg11[%c0_37, %c0_38], %52 {strides = array<i32>} : memref<128x1xf32, #tpu.memory_space<vmem>>, vector<128x1xf32>,
      %cst_39 = arith.constant 0.000000e+00 : f32
      %54 = vector.broadcast %cst_39 : f32 to vector<128x1xf32>
      %c0_40 = arith.constant 0 : index
      %c0_41 = arith.constant 0 : index
      %55 = vector.load %arg12[%c0_40, %c0_41] : memref<128x1xf32, #tpu.memory_space<vmem>>, vector<128x1xf32>
      tpu.vector_store %arg12[%c0_40, %c0_41], %54 {strides = array<i32>} : memref<128x1xf32, #tpu.memory_space<vmem>>, vector<128x1xf32>,
      %cst_42 = arith.constant 0.000000e+00 : f32
      %56 = vector.broadcast %cst_42 : f32 to vector<128x16xf32>
      %c0_43 = arith.constant 0 : index
      %c0_44 = arith.constant 0 : index
      %57 = vector.load %arg13[%c0_43, %c0_44] : memref<128x16xf32, #tpu.memory_space<vmem>>, vector<128x16xf32>
      tpu.vector_store %arg13[%c0_43, %c0_44], %56 {strides = array<i32>} : memref<128x16xf32, #tpu.memory_space<vmem>>, vector<128x16xf32>,
    } else {
    }
    %c0 = arith.constant 0 : index
    %c0_1 = arith.constant 0 : index
    %c0_2 = arith.constant 0 : index
    %3 = vector.load %arg4[%c0, %c0_1, %c0_2] : memref<1x128x16xbf16, #tpu.memory_space<vmem>>, vector<1x128x16xbf16>
    %4 = vector.shape_cast %3 : vector<1x128x16xbf16> to vector<128x16xbf16>
    %c0_3 = arith.constant 0 : index
    %c0_4 = arith.constant 0 : index
    %5 = vector.load %arg7[%c0_3, %c0_4] : memref<16x144xbf16, #tpu.memory_space<vmem>>, vector<16x144xbf16>
    %cst = arith.constant dense<0.000000e+00> : vector<128x144xf32>
    %6 = tpu.matmul %4, %5, %cst {dimension_numbers = #tpu.dot_dimension_numbers<[1], [0], [0], [1], [0, 0, 1, 1], [], []>} : vector<128x16xbf16>, vector<16x144xbf16>, vector<128x144xf32> -> vector<128x144xf32>
    %c0_5 = arith.constant 0 : index
    %c0_6 = arith.constant 0 : index
    %7 = vector.load %arg8[%c0_5, %c0_6] : memref<1x144xf32, #tpu.memory_space<vmem>>, vector<1x144xf32>
    %8 = vector.broadcast %7 : vector<1x144xf32> to vector<128x144xf32>
    %9 = arith.addf %6, %8 : vector<128x144xf32>
    %10 = vector.extract_strided_slice %9 {offsets = [0, 0], sizes = [128, 2], strides = [1, 1]} : vector<128x144xf32> to vector<128x2xf32>
    %11 = arith.truncf %10 : vector<128x2xf32> to vector<128x2xbf16>
    %12 = vector.extract_strided_slice %9 {offsets = [0, 128], sizes = [128, 16], strides = [1, 1]} : vector<128x144xf32> to vector<128x16xf32>
    %13 = arith.truncf %12 : vector<128x16xf32> to vector<128x16xbf16>
    %c0_7 = arith.constant 0 : index
    %c0_8 = arith.constant 0 : index
    %14 = vector.load %arg10[%c0_7, %c0_8] : memref<128x2xf32, #tpu.memory_space<vmem>>, vector<128x2xf32>
    %15 = arith.truncf %14 : vector<128x2xf32> to vector<128x2xbf16>
    %cst_9 = arith.constant dense<0.000000e+00> : vector<128x128xf32>
    %16 = tpu.matmul %15, %11, %cst_9 {dimension_numbers = #tpu.dot_dimension_numbers<[1], [1], [0], [0], [0, 0, 1, 0], [], []>} : vector<128x2xbf16>, vector<128x2xbf16>, vector<128x128xf32> -> vector<128x128xf32>
    %c0_10 = arith.constant 0 : index
    %c0_11 = arith.constant 0 : index
    %17 = vector.load %arg11[%c0_10, %c0_11] : memref<128x1xf32, #tpu.memory_space<vmem>>, vector<128x1xf32>
    %cst_12 = arith.constant dense<0xFF800000> : vector<128xf32>
    %18 = vector.multi_reduction <maximumf>, %16, %cst_12 [1] : vector<128x128xf32> to vector<128xf32>
    %19 = vector.shape_cast %18 : vector<128xf32> to vector<128x1xf32>
    %20 = arith.maximumf %17, %19 : vector<128x1xf32>
    %21 = arith.subf %17, %20 : vector<128x1xf32>
    %22 = math.exp %21 : vector<128x1xf32>
    %23 = vector.broadcast %20 : vector<128x1xf32> to vector<128x128xf32>
    %24 = arith.subf %16, %23 : vector<128x128xf32>
    %25 = math.exp %24 : vector<128x128xf32>
    %c0_13 = arith.constant 0 : index
    %c0_14 = arith.constant 0 : index
    %26 = vector.load %arg12[%c0_13, %c0_14] : memref<128x1xf32, #tpu.memory_space<vmem>>, vector<128x1xf32>
    %27 = arith.mulf %22, %26 : vector<128x1xf32>
    %cst_15 = arith.constant dense<0.000000e+00> : vector<128xf32>
    %28 = vector.multi_reduction <add>, %25, %cst_15 [1] : vector<128x128xf32> to vector<128xf32>
    %29 = vector.shape_cast %28 : vector<128xf32> to vector<128x1xf32>
    %30 = arith.addf %27, %29 : vector<128x1xf32>
    %c0_16 = arith.constant 0 : index
    %c0_17 = arith.constant 0 : index
    %31 = vector.load %arg12[%c0_16, %c0_17] : memref<128x1xf32, #tpu.memory_space<vmem>>, vector<128x1xf32>
    tpu.vector_store %arg12[%c0_16, %c0_17], %30 {strides = array<i32>} : memref<128x1xf32, #tpu.memory_space<vmem>>, vector<128x1xf32>,
    %c0_18 = arith.constant 0 : index
    %c0_19 = arith.constant 0 : index
    %32 = vector.load %arg13[%c0_18, %c0_19] : memref<128x16xf32, #tpu.memory_space<vmem>>, vector<128x16xf32>
    %33 = vector.broadcast %22 : vector<128x1xf32> to vector<128x16xf32>
    %34 = arith.mulf %33, %32 : vector<128x16xf32>
    %35 = arith.truncf %25 : vector<128x128xf32> to vector<128x128xbf16>
    %cst_20 = arith.constant dense<0.000000e+00> : vector<128x16xf32>
    %36 = tpu.matmul %35, %13, %cst_20 {dimension_numbers = #tpu.dot_dimension_numbers<[1], [0], [0], [1], [0, 0, 1, 1], [], []>} : vector<128x128xbf16>, vector<128x16xbf16>, vector<128x16xf32> -> vector<128x16xf32>
    %37 = arith.addf %34, %36 : vector<128x16xf32>
    %c0_21 = arith.constant 0 : index
    %c0_22 = arith.constant 0 : index
    %38 = vector.load %arg13[%c0_21, %c0_22] : memref<128x16xf32, #tpu.memory_space<vmem>>, vector<128x16xf32>
    tpu.vector_store %arg13[%c0_21, %c0_22], %37 {strides = array<i32>} : memref<128x16xf32, #tpu.memory_space<vmem>>, vector<128x16xf32>,
    %c0_23 = arith.constant 0 : index
    %c0_24 = arith.constant 0 : index
    %39 = vector.load %arg11[%c0_23, %c0_24] : memref<128x1xf32, #tpu.memory_space<vmem>>, vector<128x1xf32>
    tpu.vector_store %arg11[%c0_23, %c0_24], %20 {strides = array<i32>} : memref<128x1xf32, #tpu.memory_space<vmem>>, vector<128x1xf32>,
    %c1_i32 = arith.constant 1 : i32
    %40 = arith.cmpi eq, %arg2, %c1_i32 : i32
    %41 = arith.extui %40 : i1 to i32
    %c0_i32_25 = arith.constant 0 : i32
    %42 = arith.cmpi ne, %41, %c0_i32_25 : i32
    scf.if %42 {
      %c0_26 = arith.constant 0 : index
      %c0_27 = arith.constant 0 : index
      %43 = vector.load %arg12[%c0_26, %c0_27] : memref<128x1xf32, #tpu.memory_space<vmem>>, vector<128x1xf32>
      %44 = tpu.reciprocal %43 {approx = true} : vector<128x1xf32> -> vector<128x1xf32>
      %c0_28 = arith.constant 0 : index
      %c0_29 = arith.constant 0 : index
      %45 = vector.load %arg13[%c0_28, %c0_29] : memref<128x16xf32, #tpu.memory_space<vmem>>, vector<128x16xf32>
      %46 = vector.broadcast %44 : vector<128x1xf32> to vector<128x16xf32>
      %47 = arith.mulf %45, %46 : vector<128x16xf32>
      %c0_30 = arith.constant 0 : index
      %c0_31 = arith.constant 0 : index
      %c0_32 = arith.constant 0 : index
      %48 = vector.load %arg3[%c0_30, %c0_31, %c0_32] : memref<1x128x16xf32, #tpu.memory_space<vmem>>, vector<1x128x16xf32>
      %49 = vector.shape_cast %48 : vector<1x128x16xf32> to vector<128x16xf32>
      %50 = arith.addf %47, %49 : vector<128x16xf32>
      %c0_33 = arith.constant 0 : index
      %c0_34 = arith.constant 0 : index
      %c0_35 = arith.constant 0 : index
      %51 = vector.load %arg9[%c0_33, %c0_34, %c0_35] : memref<1x128x16xf32, #tpu.memory_space<vmem>>, vector<1x128x16xf32>
      %52 = vector.shape_cast %51 : vector<1x128x16xf32> to vector<128x16xf32>
      %53 = vector.shape_cast %50 : vector<128x16xf32> to vector<1x128x16xf32>
      tpu.vector_store %arg9[%c0_33, %c0_34, %c0_35], %53 {strides = array<i32>} : memref<1x128x16xf32, #tpu.memory_space<vmem>>, vector<1x128x16xf32>,
    } else {
    }
    return
  }
  func.func @transform_0(%arg0: i32, %arg1: i32, %arg2: i32) -> (i32, i32, i32) {
    %c0_i32 = arith.constant 0 : i32
    %c0_i32_0 = arith.constant 0 : i32
    return %arg0, %arg1, %c0_i32 : i32, i32, i32
  }
  func.func @transform_1(%arg0: i32, %arg1: i32, %arg2: i32) -> (i32, i32, i32) {
    %c0_i32 = arith.constant 0 : i32
    %c0_i32_0 = arith.constant 0 : i32
    return %arg0, %arg2, %c0_i32 : i32, i32, i32
  }
  func.func @transform_2(%arg0: i32, %arg1: i32, %arg2: i32) -> (i32, i32) {
    %c0_i32 = arith.constant 0 : i32
    %c0_i32_0 = arith.constant 0 : i32
    %c0_i32_1 = arith.constant 0 : i32
    return %c0_i32, %c0_i32_0 : i32, i32
  }
  func.func @transform_3(%arg0: i32, %arg1: i32, %arg2: i32) -> (i32, i32) {
    %c0_i32 = arith.constant 0 : i32
    %c0_i32_0 = arith.constant 0 : i32
    %c0_i32_1 = arith.constant 0 : i32
    return %c0_i32, %c0_i32_0 : i32, i32
  }
  func.func @transform_4(%arg0: i32, %arg1: i32, %arg2: i32) -> (i32, i32) {
    %c0_i32 = arith.constant 0 : i32
    %c0_i32_0 = arith.constant 0 : i32
    %c0_i32_1 = arith.constant 0 : i32
    return %c0_i32, %c0_i32_0 : i32, i32
  }
  func.func @transform_5(%arg0: i32, %arg1: i32, %arg2: i32) -> (i32, i32) {
    %c0_i32 = arith.constant 0 : i32
    %c0_i32_0 = arith.constant 0 : i32
    %c0_i32_1 = arith.constant 0 : i32
    return %c0_i32, %c0_i32_0 : i32, i32
  }
  func.func @transform_6(%arg0: i32, %arg1: i32, %arg2: i32) -> (i32, i32, i32) {
    %c0_i32 = arith.constant 0 : i32
    %c0_i32_0 = arith.constant 0 : i32
    return %arg0, %arg1, %c0_i32 : i32, i32, i32
  }
}

</mosaic_0001>

<bundles_post_ra>
// kernel: tpu_custom_call.1
= control target key start
LH: loop header
LB: loop body
LE: loop exit
PB: predicated region body
PF: predicated region fallthrough
CT: control target
= control target key end

     0   :  { %s2336_s21 = smov 0   ;;  %s2338_s22 = smov 0   ;;  %s2996_s0 = inlined_call_operand.vmem [shape: f32[2,256,16], index: 0, kind: input, shape index: {}]   ;;  %s2997_s1 = inlined_call_operand.vmem [shape: bf16[2,256,16], index: 1, kind: input, shape index: {}]   ;;  %s2998_s2 = inlined_call_operand.vmem [shape: bf16[16,2], index: 2, kind: input, shape index: {}]   ;;  %s2999_s3 = inlined_call_operand.vmem [shape: f32[1,2], index: 3, kind: input, shape index: {}]   ;;  %s3000_s4 = inlined_call_operand.vmem [shape: bf16[16,144], index: 4, kind: input, shape index: {}]   ;;  %s3001_s5 = inlined_call_operand.vmem [shape: f32[1,144], index: 5, kind: input, shape index: {}]   ;;  %s3002_s6 = inlined_call_operand.vmem [shape: f32[2,256,16], index: 6, kind: output, shape index: {}]  }
   0x1   :  { %s2340_s23 = smov 0   ;;  %s2342_s24 = smov 0  }
   0x2   :  { %s2344_s25 = smov 0   ;;  %s2346_s26 = smov 0  }
   0x3   :  { %s2348_s27 = smov 0  }
   0x4 LB: > { %s28_s28 = sadd.s32 1, %s2283_s24  ;;  %s31_s29 = sadd.s32 1, %s2287_s25  ;;  %s2295_s27 = sphi %s2348_s27, %s16_s27   ;;  %s2291_s26 = sphi %s2346_s26, %s3008_s26   ;;  %s2287_s25 = sphi %s2344_s25, %s3007_s25   ;;  %s2283_s24 = sphi %s2342_s24, %s3006_s24   ;;  %s2279_s23 = sphi %s2340_s23, %s3005_s23   ;;  %s2275_s22 = sphi %s2338_s22, %s3004_s22   ;;  %s2271_s21 = sphi %s2336_s21, %s3003_s21  }
   0x5   : > { %p29_p0 = scmp.ge.s32.totalorder %s28_s28, 2  ;;  %p1886_p1 = scmp.ge.s32.totalorder %s2295_s27, 1 }
   0x6   : > { %p257_p2 = scmp.lt.s32.totalorder %s2295_s27, 9  ;;  %s35_s30 = sadd.s32 1, %s2291_s26 }
   0x7   : > { %s3010_s28 = smov (%p29_p0, %s28_s28), 0  ;;  %s3012_s29 = smov (!%p29_p0, %s31_s29), %s2287_s25 }
   0x8   : > { %p258_p3 = pnand %p1886_p1, %p257_p2  ;;  %p33_p4 = scmp.ge.s32.totalorder %s3012_s29, 2 }
   0x9   : > { %s1887_s7 = sshll.u32 (!%p258_p3), %s2275_s22, 4  ;;  %p305_p6 = scmp.lt.s32.totalorder (!%p258_p3), %s2279_s23, 1 }
   0xa   : > { %s3014_s29 = smov (%p33_p4, %s3012_s29), 0  ;;  %s3016_s30 = smov (!%p33_p4, %s35_s30), %s2291_s26 }
   0xb   : > { %p37_p5 = scmp.ge.s32.totalorder %s3016_s30, 2  ;;  %261 = sbr.rel (%p258_p3) target bundleno = 1464 (0x5b8), region = 44 }
   0xc   : > { %p307_p7 = scmp.lt.s32.totalorder (!%p258_p3), %s1887_s7, 31  ;;  %s1890_s8 = sshll.u32 (!%p258_p3), %s2271_s21, 4 }
   0xd   : > { %s3018_s30 = smov (%p37_p5, %s3016_s30), 0  ;;  %p317_p8 = scmp.lt.s32.totalorder (!%p258_p3), %s1890_s8, 31 }
   0xe   : > { %p1896_p9 = scmp.ne.s32.totalorder (!%p258_p3), %s2271_s21, 0 }
  0x10   : > { %s3020_s23 = smov (!%p305_p6, %s2279_s23), 1  ;;  %s3022_s7 = smov (!%p307_p7, %s1887_s7), 31 }
  0x11   : > { %s1888_s9 = sshll.u32 %s3020_s23, 5  ;;  %s3024_s8 = smov (!%p317_p8, %s1890_s8), 31 }
  0x12   : > { %s310_s10 = sadd.s32 %s1888_s9, %s3022_s7  ;;  %s320_s18 = sadd.s32 %s1888_s9, %s3024_s8 }
  0x13   : > { %s1889_s11 = sshll.u32 %s310_s10, 3  ;;  %s1892_s19 = sshll.u32 %s320_s18, 2 }
  0x14   : > { %s2384_s14 = scalar_lea.vmem %s2996_s0, %s1889_s11  ;;  %s2389_s17 = scalar_lea.vmem %s3002_s6, %s1889_s11 }
  0x15   : > { %s2394_s23 = scalar_lea.vmem %s2997_s1, %s1892_s19  ;;  %338 = sbr.rel (%p1896_p9) target bundleno = 243 (0xf3), region = 48 }
  0x1a   : > { %v2129_v0 = vld [vmem:[%s2998_s2] sm:$0xff]   ;;  %vm378_vm0 = vcmask 130048   ;;  %v2404_v2 = vld [vmem:[%s2384_s14 + $0x8] sm:$0xff]  ;;  %vm517_vm1 = vcmask 7168   ;;  %v2297_v5 = vmov -inf   ;;  %v2298_v6 = vmov 0.0  }
  0x1b   : > { %v2401_v1 = vld [vmem:[%s2384_s14] sm:$0xff]  ;;  %1977 = vmatprep.subr.bf16.mxu0 %v2129_v0  ;;  %2059 = vmatprep.subr.bf16.mxu1 %v2129_v0  ;;  %518 = vst.msk [vmem:[#allocation3] sm:$0xff] %vm517_vm1, %v2297_v5  ;;  %519 = vst.msk [vmem:[#allocation3 + $0x8] sm:$0xff] %vm517_vm1, %v2297_v5  ;;  %v348_v7 = vld [vmem:[%s2384_s14 + $0x48] sm:$0xff]  ;;  %vm500_vm2 = vcmask 15360  }
  0x1c   : > { %v2407_v3 = vld [vmem:[%s2384_s14 + $0x40] sm:$0xff]  ;;  %v355_v4 = vpack.c.bf16 %v2404_v2, %v2401_v1  ;;  %520 = vst.msk [vmem:[#allocation3 + $0x10] sm:$0xff] %vm517_vm1, %v2297_v5  ;;  %521 = vst.msk [vmem:[#allocation3 + $0x18] sm:$0xff] %vm517_vm1, %v2297_v5  ;;  %v341_v8 = vld [vmem:[%s2384_s14 + $0x10] sm:$0xff]  ;;  %1978 = vmatpush3.bf16.msra.mxu0 %v2129_v0  ;;  %2060 = vmatpush3.bf16.msra.mxu1 %v2129_v0 }
  0x1d   : > { %522 = vst.msk [vmem:[#allocation3 + $0x20] sm:$0xff] %vm517_vm1, %v2297_v5  ;;  %523 = vst.msk [vmem:[#allocation3 + $0x28] sm:$0xff] %vm517_vm1, %v2297_v5  ;;  %v342_v9 = vld [vmem:[%s2384_s14 + $0x18] sm:$0xff]  ;;  %v359_v10 = vpack.c.bf16 %v348_v7, %v2407_v3  ;;  %v349_v12 = vld [vmem:[%s2384_s14 + $0x50] sm:$0xff] }
  0x1e   : > { %524 = vst.msk [vmem:[#allocation3 + $0x30] sm:$0xff] %vm517_vm1, %v2297_v5  ;;  %525 = vst.msk [vmem:[#allocation3 + $0x38] sm:$0xff] %vm517_vm1, %v2297_v5  ;;  %v356_v11 = vpack.c.bf16 %v342_v9, %v341_v8  ;;  %v350_v13 = vld [vmem:[%s2384_s14 + $0x58] sm:$0xff]  ;;  %v343_v14 = vld [vmem:[%s2384_s14 + $0x20] sm:$0xff]  ;;  %1979 = vmatprep.mubr.msk.bf16.mxu0 %vm378_vm0, %v355_v4 }
  0x1f   : > { %526 = vst.msk [vmem:[#allocation3 + $0x40] sm:$0xff] %vm517_vm1, %v2297_v5  ;;  %527 = vst.msk [vmem:[#allocation3 + $0x48] sm:$0xff] %vm517_vm1, %v2297_v5  ;;  %v360_v15 = vpack.c.bf16 %v350_v13, %v349_v12  ;;  %v344_v16 = vld [vmem:[%s2384_s14 + $0x28] sm:$0xff]  ;;  %v351_v17 = vld [vmem:[%s2384_s14 + $0x60] sm:$0xff]  ;;  %1987 = vmatprep.mubr.msk.bf16.mxu1 %vm378_vm0, %v359_v10 }
  0x20   : > { %528 = vst.msk [vmem:[#allocation3 + $0x50] sm:$0xff] %vm517_vm1, %v2297_v5  ;;  %529 = vst.msk [vmem:[#allocation3 + $0x58] sm:$0xff] %vm517_vm1, %v2297_v5  ;;  %v352_v18 = vld [vmem:[%s2384_s14 + $0x68] sm:$0xff]  ;;  %v357_v19 = vpack.c.bf16 %v344_v16, %v343_v14  ;;  %1980 = vmatmul.mubr.msk.bf16.vlgmr.msra.gmra.mxu0 %vm378_vm0, %v356_v11  ;;  %v345_v21 = vld [vmem:[%s2384_s14 + $0x30] sm:$0xff] }
  0x21   : > { %530 = vst.msk [vmem:[#allocation3 + $0x60] sm:$0xff] %vm517_vm1, %v2297_v5  ;;  %531 = vst.msk [vmem:[#allocation3 + $0x68] sm:$0xff] %vm517_vm1, %v2297_v5  ;;  %v361_v20 = vpack.c.bf16 %v352_v18, %v351_v17  ;;  %1988 = vmatmul.mubr.msk.bf16.vlgmr.msra.gmra.mxu1 %vm378_vm0, %v360_v15  ;;  %v346_v22 = vld [vmem:[%s2384_s14 + $0x38] sm:$0xff]  ;;  %v353_v23 = vld [vmem:[%s2384_s14 + $0x70] sm:$0xff] }
  0x22   : > { %532 = vst.msk [vmem:[#allocation3 + $0x70] sm:$0xff] %vm517_vm1, %v2297_v5  ;;  %533 = vst.msk [vmem:[#allocation3 + $0x78] sm:$0xff] %vm517_vm1, %v2297_v5  ;;  %1983 = vmatprep.mubr.msk.bf16.mxu0 %vm378_vm0, %v357_v19  ;;  %v354_v24 = vld [vmem:[%s2384_s14 + $0x78] sm:$0xff]  ;;  %v358_v25 = vpack.c.bf16 %v346_v22, %v345_v21  ;;  %v1897_v27 = vld [vmem:[%s2999_s3] ss:$0 sm:$0xff] }
  0x23   : > { %534 = vst.msk [vmem:[#allocation4] sm:$0xff] %vm517_vm1, %v2298_v6  ;;  %535 = vst.msk [vmem:[#allocation4 + $0x8] sm:$0xff] %vm517_vm1, %v2298_v6  ;;  %1991 = vmatprep.mubr.msk.bf16.mxu1 %vm378_vm0, %v361_v20  ;;  %v362_v26 = vpack.c.bf16 %v354_v24, %v353_v23 }
  0x24   : > { %536 = vst.msk [vmem:[#allocation4 + $0x10] sm:$0xff] %vm517_vm1, %v2298_v6  ;;  %537 = vst.msk [vmem:[#allocation4 + $0x18] sm:$0xff] %vm517_vm1, %v2298_v6 }
  0x25   : > { %538 = vst.msk [vmem:[#allocation4 + $0x20] sm:$0xff] %vm517_vm1, %v2298_v6  ;;  %539 = vst.msk [vmem:[#allocation4 + $0x28] sm:$0xff] %vm517_vm1, %v2298_v6 }
  0x26   : > { %540 = vst.msk [vmem:[#allocation4 + $0x30] sm:$0xff] %vm517_vm1, %v2298_v6  ;;  %541 = vst.msk [vmem:[#allocation4 + $0x38] sm:$0xff] %vm517_vm1, %v2298_v6 }
  0x27   : > { %542 = vst.msk [vmem:[#allocation4 + $0x40] sm:$0xff] %vm517_vm1, %v2298_v6  ;;  %543 = vst.msk [vmem:[#allocation4 + $0x48] sm:$0xff] %vm517_vm1, %v2298_v6 }
  0x28   : > { %544 = vst.msk [vmem:[#allocation4 + $0x50] sm:$0xff] %vm517_vm1, %v2298_v6  ;;  %545 = vst.msk [vmem:[#allocation4 + $0x58] sm:$0xff] %vm517_vm1, %v2298_v6  ;;  %1984 = vmatmul.mubr.msk.bf16.gmra.mxu0 %vm378_vm0, %v358_v25 }
  0x29   : > { %546 = vst.msk [vmem:[#allocation4 + $0x60] sm:$0xff] %vm517_vm1, %v2298_v6  ;;  %547 = vst.msk [vmem:[#allocation4 + $0x68] sm:$0xff] %vm517_vm1, %v2298_v6  ;;  %1992 = vmatmul.mubr.msk.bf16.gmra.mxu1 %vm378_vm0, %v362_v26 }
  0x2a   : > { %548 = vst.msk [vmem:[#allocation4 + $0x70] sm:$0xff] %vm517_vm1, %v2298_v6  ;;  %549 = vst.msk [vmem:[#allocation4 + $0x78] sm:$0xff] %vm517_vm1, %v2298_v6 }
  0x2b   : > { %550 = vst.msk [vmem:[#allocation5] sm:$0xff] %vm378_vm0, %v2298_v6  ;;  %551 = vst.msk [vmem:[#allocation5 + $0x8] sm:$0xff] %vm378_vm0, %v2298_v6 }
  0x2c   : > { %552 = vst.msk [vmem:[#allocation5 + $0x10] sm:$0xff] %vm378_vm0, %v2298_v6  ;;  %553 = vst.msk [vmem:[#allocation5 + $0x18] sm:$0xff] %vm378_vm0, %v2298_v6 }
  0x2d   : > { %554 = vst.msk [vmem:[#allocation5 + $0x20] sm:$0xff] %vm378_vm0, %v2298_v6  ;;  %555 = vst.msk [vmem:[#allocation5 + $0x28] sm:$0xff] %vm378_vm0, %v2298_v6 }
  0x2e   : > { %556 = vst.msk [vmem:[#allocation5 + $0x30] sm:$0xff] %vm378_vm0, %v2298_v6  ;;  %557 = vst.msk [vmem:[#allocation5 + $0x38] sm:$0xff] %vm378_vm0, %v2298_v6 }
  0x2f   : > { %558 = vst.msk [vmem:[#allocation5 + $0x40] sm:$0xff] %vm378_vm0, %v2298_v6  ;;  %559 = vst.msk [vmem:[#allocation5 + $0x48] sm:$0xff] %vm378_vm0, %v2298_v6 }
  0x30   : > { %560 = vst.msk [vmem:[#allocation5 + $0x50] sm:$0xff] %vm378_vm0, %v2298_v6  ;;  %561 = vst.msk [vmem:[#allocation5 + $0x58] sm:$0xff] %vm378_vm0, %v2298_v6 }
  0x31   : > { %562 = vst.msk [vmem:[#allocation5 + $0x60] sm:$0xff] %vm378_vm0, %v2298_v6  ;;  %563 = vst.msk [vmem:[#allocation5 + $0x68] sm:$0xff] %vm378_vm0, %v2298_v6 }
  0x32   : > { %564 = vst.msk [vmem:[#allocation5 + $0x70] sm:$0xff] %vm378_vm0, %v2298_v6  ;;  %565 = vst.msk [vmem:[#allocation5 + $0x78] sm:$0xff] %vm378_vm0, %v2298_v6 }
  0xe0   : > { %v1981_v28 = vpop.f32.mrf.mxu0 }
  0xe1   : > { %v1989_v29 = vpop.f32.mrf.mxu1  ;;  %v446_v30 = vadd.f32 %v1981_v28, %v1897_v27 }
  0xe2   : > { %v478_v31 = vadd.f32 %v1989_v29, %v1897_v27  ;;  %v437_v32 = vpop.f32.mrf.mxu0 }
  0xe3   : > { %v469_v33 = vpop.f32.mrf.mxu1  ;;  %503 = vst.msk [vmem:[#allocation2 + $0x10] sm:$0xff] %vm500_vm2, %v446_v30  ;;  %v438_v34 = vadd.f32 %v1897_v27, %v437_v32 }
  0xe4   : > { %511 = vst.msk [vmem:[#allocation2 + $0x50] sm:$0xff] %vm500_vm2, %v478_v31  ;;  %v470_v35 = vadd.f32 %v1897_v27, %v469_v33  ;;  %v1982_v36 = vpop.f32.mrf.mxu0 }
  0xe5   : > { %v1990_v37 = vpop.f32.mrf.mxu1  ;;  %501 = vst.msk [vmem:[#allocation2] sm:$0xff] %vm500_vm2, %v438_v34  ;;  %v449_v38 = vadd.f32 %v1982_v36, %v1897_v27 }
  0xe6   : > { %509 = vst.msk [vmem:[#allocation2 + $0x40] sm:$0xff] %vm500_vm2, %v470_v35  ;;  %v481_v39 = vadd.f32 %v1990_v37, %v1897_v27  ;;  %v440_v40 = vpop.f32.mrf.mxu0 }
  0xe7   : > { %v472_v41 = vpop.f32.mrf.mxu1  ;;  %504 = vst.msk [vmem:[#allocation2 + $0x18] sm:$0xff] %vm500_vm2, %v449_v38  ;;  %v441_v42 = vadd.f32 %v1897_v27, %v440_v40 }
  0xe8   : > { %512 = vst.msk [vmem:[#allocation2 + $0x58] sm:$0xff] %vm500_vm2, %v481_v39  ;;  %v473_v43 = vadd.f32 %v1897_v27, %v472_v41  ;;  %v1985_v44 = vpop.f32.mrf.mxu0 }
  0xe9   : > { %v1993_v45 = vpop.f32.mrf.mxu1  ;;  %502 = vst.msk [vmem:[#allocation2 + $0x8] sm:$0xff] %vm500_vm2, %v441_v42  ;;  %v462_v46 = vadd.f32 %v1985_v44, %v1897_v27 }
  0xea   : > { %510 = vst.msk [vmem:[#allocation2 + $0x48] sm:$0xff] %vm500_vm2, %v473_v43  ;;  %v494_v47 = vadd.f32 %v1993_v45, %v1897_v27  ;;  %v453_v48 = vpop.f32.mrf.mxu0 }
  0xeb   : > { %v485_v49 = vpop.f32.mrf.mxu1  ;;  %507 = vst.msk [vmem:[#allocation2 + $0x30] sm:$0xff] %vm500_vm2, %v462_v46  ;;  %v454_v50 = vadd.f32 %v1897_v27, %v453_v48 }
  0xec   : > { %515 = vst.msk [vmem:[#allocation2 + $0x70] sm:$0xff] %vm500_vm2, %v494_v47  ;;  %v486_v51 = vadd.f32 %v1897_v27, %v485_v49  ;;  %v1986_v52 = vpop.f32.mrf.mxu0 }
  0xed   : > { %v1994_v53 = vpop.f32.mrf.mxu1  ;;  %505 = vst.msk [vmem:[#allocation2 + $0x20] sm:$0xff] %vm500_vm2, %v454_v50  ;;  %v465_v54 = vadd.f32 %v1986_v52, %v1897_v27 }
  0xee   : > { %513 = vst.msk [vmem:[#allocation2 + $0x60] sm:$0xff] %vm500_vm2, %v486_v51  ;;  %v497_v55 = vadd.f32 %v1994_v53, %v1897_v27  ;;  %v456_v56 = vpop.f32.mrf.mxu0 }
  0xef   : > { %v488_v57 = vpop.f32.mrf.mxu1  ;;  %508 = vst.msk [vmem:[#allocation2 + $0x38] sm:$0xff] %vm500_vm2, %v465_v54  ;;  %v457_v58 = vadd.f32 %v1897_v27, %v456_v56 }
  0xf0   : > { %516 = vst.msk [vmem:[#allocation2 + $0x78] sm:$0xff] %vm500_vm2, %v497_v55  ;;  %v489_v59 = vadd.f32 %v1897_v27, %v488_v57 }
  0xf1   : > { %506 = vst.msk [vmem:[#allocation2 + $0x28] sm:$0xff] %vm500_vm2, %v457_v58 }
  0xf2   : > { %514 = vst.msk [vmem:[#allocation2 + $0x68] sm:$0xff] %vm500_vm2, %v489_v59 }
  0xf3 PF: > { %v2132_v60 = vld [vmem:[%s3000_s4 + $0x4] ss:$8 sps:$4 sm:$0xff]   ;;  %v2134_v61 = vld [vmem:[%s3000_s4] ss:$8 sps:$4 sm:$0xff]   ;;  %v2299_v62 = vmov 0   ;;  %vm646_vm3 = vcmask 130048   ;;  %v586_v7 = vlaneseq }
  0xf4   : > { %703 = vmatprep.mubr.bf16.mxu0 %v2299_v62  ;;  %2131 = vset.pattern.permute.xlu1 %v2299_v62  ;;  %v2135_v63 = vld [vmem:[%s2394_s23] sm:$0xff]   ;;  %v2136_v0 = vld [vmem:[%s2394_s23 + $0x8] sm:$0xff]   ;;  %v2137_v1 = vld [vmem:[%s2394_s23 + $0x10] sm:$0xff]   ;;  %vm824_vm4 = vcmask 15360   ;;  %vm1290_vm5 = vcmask 7168   ;;  %p1933_p10 = scmp.ne.s32.totalorder %s2271_s21, 1 }
  0xf5   : > { %685 = vmatprep.subr.bf16.mxu0 %v2132_v60  ;;  %2130 = vset.pattern.permute.xlu0 %v2299_v62  ;;  %v2138_v2 = vld [vmem:[%s2394_s23 + $0x18] sm:$0xff]   ;;  %v2139_v3 = vld [vmem:[%s2394_s23 + $0x20] sm:$0xff]   ;;  %v2140_v4 = vld [vmem:[%s2394_s23 + $0x28] sm:$0xff]   ;;  %v587_v8 = vshrl.u32 %v586_v7, 7 }
  0xf6   : > { %686 = vmatpush1.bf16.msra.mxu0 %v2134_v61  ;;  %v2141_v5 = vld [vmem:[%s2394_s23 + $0x30] sm:$0xff]   ;;  %v2142_v6 = vld [vmem:[%s2394_s23 + $0x38] sm:$0xff]   ;;  %v800_v9 = vld [vmem:[#allocation2] sm:$0xff] }
  0xf7   : > { %v801_v10 = vld [vmem:[#allocation2 + $0x8] sm:$0xff]  ;;  %v588_v12 = vsub.s32 0, %v587_v8  ;;  %v584_v13 = vld [vmem:[%s3001_s5] sm:$0x3]  ;;  %v592_v14 = vsub.s32 1, %v587_v8 }
  0xf8   : > { %v816_v11 = vpack.c.bf16 %v801_v10, %v800_v9 }
  0xf9   : > { %1917 = vmatmul.mubr.msk.bf16.vlgmr.msra.gmra.mxu0 %vm646_vm3, %v2135_v63  ;;  %v2526_v16 = vrot.slane %v584_v13, %v588_v12  ;;  %v2528_v18 = vrot.slane %v584_v13, %v592_v14 }
  0xfa   : > { %713 = vmatprep.mubr.bf16.mxu0 %v2299_v62  ;;  %2011 = vmatprep.mubr.msk.bf16.mxu1 %vm824_vm4, %v816_v11 }
 0x101   : > { %1918 = vmatmul.mubr.msk.bf16.gmra.mxu0 %vm646_vm3, %v2136_v0 }
 0x102   : > { %723 = vmatprep.mubr.bf16.mxu0 %v2299_v62 }
 0x109   : > { %1919 = vmatmul.mubr.msk.bf16.gmra.mxu0 %vm646_vm3, %v2137_v1 }
 0x10a   : > { %733 = vmatprep.mubr.bf16.mxu0 %v2299_v62 }
 0x111   : > { %1920 = vmatmul.mubr.msk.bf16.gmra.mxu0 %vm646_vm3, %v2138_v2 }
 0x112   : > { %743 = vmatprep.mubr.bf16.mxu0 %v2299_v62 }
 0x119   : > { %1921 = vmatmul.mubr.msk.bf16.gmra.mxu0 %vm646_vm3, %v2139_v3 }
 0x11a   : > { %753 = vmatprep.mubr.bf16.mxu0 %v2299_v62 }
 0x121   : > { %1922 = vmatmul.mubr.msk.bf16.gmra.mxu0 %vm646_vm3, %v2140_v4 }
 0x122   : > { %763 = vmatprep.mubr.bf16.mxu0 %v2299_v62 }
 0x129   : > { %1923 = vmatmul.mubr.msk.bf16.gmra.mxu0 %vm646_vm3, %v2141_v5 }
 0x12a   : > { %773 = vmatprep.mubr.bf16.mxu0 %v2299_v62 }
 0x131   : > { %1924 = vmatmul.mubr.msk.bf16.gmra.mxu0 %vm646_vm3, %v2142_v6 }
 0x1b9   : > { %v705_v15 = vpop.f32.mrf.mxu0 }
 0x1ba   : > { %v706_v20 = vadd.f32 %v705_v15, %v2526_v16 }
 0x1bb   : > { %v707_v17 = vpop.f32.mrf.mxu0 }
 0x1bc   : > { %v708_v23 = vadd.f32 %v707_v17, %v2528_v18 }
 0x1bd   : > { %v709_v19 = vpop.f32.mrf.mxu0 }
 0x1be   : > { %v710_v21 = vadd.f32 %v709_v19, %v2526_v16 }
 0x1bf   : > { %v711_v22 = vpop.f32.mrf.mxu0 }
 0x1c0   : > { %v2533_v24 = vpack.c.bf16 %v710_v21, %v706_v20  ;;  %v712_v25 = vadd.f32 %v711_v22, %v2528_v18 }
 0x1c1   : > { %v715_v26 = vpop.f32.mrf.mxu0 }
 0x1c2   : > { %v2536_v27 = vpack.c.bf16 %v712_v25, %v708_v23  ;;  %v716_v30 = vadd.f32 %v715_v26, %v2526_v16 }
 0x1c3   : > { %v717_v28 = vpop.f32.mrf.mxu0 }
 0x1c4   : > { %v718_v33 = vadd.f32 %v717_v28, %v2528_v18 }
 0x1c5   : > { %v719_v29 = vpop.f32.mrf.mxu0 }
 0x1c6   : > { %v720_v31 = vadd.f32 %v719_v29, %v2526_v16 }
 0x1c7   : > { %v721_v32 = vpop.f32.mrf.mxu0 }
 0x1c8   : > { %v2541_v34 = vpack.c.bf16 %v720_v31, %v716_v30  ;;  %v722_v35 = vadd.f32 %v721_v32, %v2528_v18 }
 0x1c9   : > { %v725_v36 = vpop.f32.mrf.mxu0 }
 0x1ca   : > { %v2544_v37 = vpack.c.bf16 %v722_v35, %v718_v33  ;;  %v726_v40 = vadd.f32 %v725_v36, %v2526_v16 }
 0x1cb   : > { %v2546_v38 = vpop.f32.mrf.mxu0 }
 0x1cc   : > { %v728_v33 = vadd.f32 %v2546_v38, %v2528_v18 }
 0x1cd   : > { %v729_v39 = vpop.f32.mrf.mxu0 }
 0x1ce   : > { %v730_v41 = vadd.f32 %v729_v39, %v2526_v16 }
 0x1cf   : > { %v731_v42 = vpop.f32.mrf.mxu0 }
 0x1d0   : > { %v2550_v43 = vpack.c.bf16 %v730_v41, %v726_v40  ;;  %v732_v30 = vadd.f32 %v731_v42, %v2528_v18 }
 0x1d1   : > { %v2552_v44 = vpop.f32.mrf.mxu0 }
 0x1d2   : > { %v794_v39 = vpack.c.bf16 %v732_v30, %v728_v33  ;;  %v736_v41 = vadd.f32 %v2552_v44, %v2526_v16  ;;  %v802_v44 = vld [vmem:[#allocation2 + $0x10] sm:$0xff]  ;;  %v2675_v30 = vld [vmem:[#allocation3 + $0x20] sm:$0xff] }
 0x1d3   : > { %v737_v45 = vpop.f32.mrf.mxu0 }
 0x1d4   : > { %v738_v28 = vadd.f32 %v737_v45, %v2528_v18  ;;  %v803_v45 = vld [vmem:[#allocation2 + $0x18] sm:$0xff] }
 0x1d5   : > { %v2554_v46 = vpop.f32.mrf.mxu0 }
 0x1d6   : > { %v740_v40 = vadd.f32 %v2554_v46, %v2526_v16  ;;  %v804_v46 = vld [vmem:[#allocation2 + $0x20] sm:$0xff] }
 0x1d7   : > { %v741_v47 = vpop.f32.mrf.mxu0 }
 0x1d8   : > { %v742_v25 = vadd.f32 %v741_v47, %v2528_v18  ;;  %v787_v42 = vpack.c.bf16 %v740_v40, %v736_v41  ;;  %v805_v47 = vld [vmem:[#allocation2 + $0x28] sm:$0xff] }
 0x1d9   : > { %v745_v48 = vpop.f32.mrf.mxu0  ;;  %v2685_v41 = vld [vmem:[#allocation3 + $0x28] sm:$0xff] }
 0x1da   : > { %v795_v31 = vpack.c.bf16 %v742_v25, %v738_v28  ;;  %v746_v32 = vadd.f32 %v745_v48, %v2526_v16  ;;  %v859_v38 = vsel %vm824_vm4, %v787_v42, 0  ;;  %v818_v48 = vpack.c.bf16 %v805_v47, %v804_v46  ;;  %v2670_v25 = vld [vmem:[#allocation3 + $0x8] sm:$0xff]  ;;  %v2703_v46 = vld [vmem:[#allocation3 + $0x50] sm:$0xff] }
 0x1db   : > { %v747_v49 = vpop.f32.mrf.mxu0 }
 0x1dc   : > { %v748_v21 = vadd.f32 %v747_v49, %v2528_v18  ;;  %v806_v49 = vld [vmem:[#allocation2 + $0x30] sm:$0xff] }
 0x1dd   : > { %v749_v50 = vpop.f32.mrf.mxu0 }
 0x1de   : > { %v750_v29 = vadd.f32 %v749_v50, %v2526_v16  ;;  %v808_v50 = vld [vmem:[#allocation2 + $0x40] sm:$0xff] }
 0x1df   : > { %v751_v51 = vpop.f32.mrf.mxu0 }
 0x1e0   : > { %v752_v17 = vadd.f32 %v751_v51, %v2528_v18  ;;  %v788_v35 = vpack.c.bf16 %v750_v29, %v746_v32  ;;  %v809_v51 = vld [vmem:[#allocation2 + $0x48] sm:$0xff]  ;;  %v977_v32 = vld [vmem:[#allocation3 + $0x38] sm:$0xff] }
 0x1e1   : > { %v755_v52 = vpop.f32.mrf.mxu0 }
 0x1e2   : > { %v756_v19 = vadd.f32 %v755_v52, %v2526_v16  ;;  %v796_v26 = vpack.c.bf16 %v752_v17, %v748_v21  ;;  %v970_v17 = vld [vmem:[#allocation3] sm:$0xff]  ;;  %v973_v21 = vld [vmem:[#allocation3 + $0x18] sm:$0xff] }
 0x1e3   : > { %v757_v53 = vpop.f32.mrf.mxu0 }
 0x1e4   : > { %v758_v14 = vadd.f32 %v757_v53, %v2528_v18  ;;  %v820_v53 = vpack.c.bf16 %v809_v51, %v808_v50 }
 0x1e5   : > { %v759_v54 = vpop.f32.mrf.mxu0 }
 0x1e6   : > { %v760_v15 = vadd.f32 %v759_v54, %v2526_v16  ;;  %v811_v54 = vld [vmem:[#allocation2 + $0x58] sm:$0xff] }
 0x1e7   : > { %v761_v55 = vpop.f32.mrf.mxu0 }
 0x1e8   : > { %v762_v12 = vadd.f32 %v761_v55, %v2528_v18  ;;  %v789_v22 = vpack.c.bf16 %v760_v15, %v756_v19  ;;  %v812_v55 = vld [vmem:[#allocation2 + $0x60] sm:$0xff] }
 0x1e9   : > { %v765_v56 = vpop.f32.mrf.mxu0 }
 0x1ea   : > { %v766_v2 = vadd.f32 %v765_v56, %v2526_v16  ;;  %v797_v20 = vpack.c.bf16 %v762_v12, %v758_v14  ;;  %v865_v36 = vsel %vm824_vm4, %v789_v22, 0  ;;  %v813_v56 = vld [vmem:[#allocation2 + $0x68] sm:$0xff]  ;;  %v2662_v14 = vld [vmem:[#allocation3 + $0x10] sm:$0xff] }
 0x1eb   : > { %v767_v57 = vpop.f32.mrf.mxu0 }
 0x1ec   : > { %v768_v8 = vadd.f32 %v767_v57, %v2528_v18 }
 0x1ed   : > { %v769_v58 = vpop.f32.mrf.mxu0 }
 0x1ee   : > { %v770_v63 = vadd.f32 %v769_v58, %v2526_v16  ;;  %v822_v58 = vpack.c.bf16 %v813_v56, %v812_v55  ;;  %v2720_v55 = vld [vmem:[#allocation3 + $0x78] sm:$0xff] }
 0x1ef   : > { %v771_v59 = vpop.f32.mrf.mxu0 }
 0x1f0   : > { %v772_v4 = vadd.f32 %v771_v59, %v2528_v18  ;;  %v790_v9 = vpack.c.bf16 %v770_v63, %v766_v2  ;;  %v814_v59 = vld [vmem:[#allocation2 + $0x70] sm:$0xff] }
 0x1f1   : > { %v775_v60 = vpop.f32.mrf.mxu0 }
 0x1f2   : > { %v776_v0 = vadd.f32 %v775_v60, %v2526_v16  ;;  %v798_v13 = vpack.c.bf16 %v772_v4, %v768_v8  ;;  %v868_v23 = vsel %vm824_vm4, %v790_v9, 0  ;;  %v815_v60 = vld [vmem:[#allocation2 + $0x78] sm:$0xff] }
 0x1f3   : > { %v777_v61 = vpop.f32.mrf.mxu0 }
 0x1f4   : > { %v778_v5 = vadd.f32 %v777_v61, %v2528_v18  ;;  %v823_v61 = vpack.c.bf16 %v815_v60, %v814_v59  ;;  %v2727_v60 = vld [vmem:[#allocation3 + $0x70] sm:$0xff] }
 0x1f5   : > { %v779_v62 = vpop.f32.mrf.mxu0 }
 0x1f6   : > { %v780_v1 = vadd.f32 %v779_v62, %v2526_v16  ;;  %v856_v16 = vsel %vm824_vm4, %v2550_v43, 0 }
 0x1f7   : > { %v781_v3 = vpop.f32.mrf.mxu0 }
 0x1f8   : > { %v782_v6 = vadd.f32 %v781_v3, %v2528_v18  ;;  %v791_v7 = vpack.c.bf16 %v780_v1, %v776_v0  ;;  %v862_v18 = vsel %vm824_vm4, %v788_v35, 0 }
 0x1fa   : > { %v799_v10 = vpack.c.bf16 %v782_v6, %v778_v5  ;;  %2061 = vmatprep.subr.msk.bf16.mxu1 %vm824_vm4, %v791_v7  ;;  %v871_v11 = vsel %vm824_vm4, %v791_v7, 0 }
 0x1fb   : > { %1996 = vmatpush3.bf16.xpose.msra.mxu1 %v871_v11 }
 0x1fc   : > { %2062 = vmatprep.subr.msk.bf16.mxu1 %vm824_vm4, %v790_v9  ;;  %2027 = vmatprep.subr.bf16.mxu0 %v799_v10 }
 0x1fd   : > { %2028 = vmatpush3.bf16.msra.mxu0 %v799_v10 }
 0x1fe   : > { %2029 = vmatprep.subr.bf16.mxu0 %v798_v13 }
 0x201   : > { %2030 = vmatpush3.bf16.msra.mxu0 %v798_v13 }
 0x202   : > { %2031 = vmatprep.subr.bf16.mxu0 %v797_v20 }
 0x203   : > { %1998 = vmatpush3.bf16.xpose.msra.mxu1 %v868_v23 }
 0x204   : > { %2063 = vmatprep.subr.msk.bf16.mxu1 %vm824_vm4, %v789_v22 }
 0x205   : > { %2032 = vmatpush3.bf16.msra.mxu0 %v797_v20 }
 0x206   : > { %2033 = vmatprep.subr.bf16.mxu0 %v796_v26 }
 0x209   : > { %2034 = vmatpush3.bf16.msra.mxu0 %v796_v26 }
 0x20a   : > { %2035 = vmatprep.subr.bf16.mxu0 %v795_v31 }
 0x20b   : > { %2000 = vmatpush3.bf16.xpose.msra.mxu1 %v865_v36  ;;  %v2681_v36 = vld [vmem:[#allocation3 + $0x30] sm:$0xff] }
 0x20c   : > { %2064 = vmatprep.subr.msk.bf16.mxu1 %vm824_vm4, %v788_v35 }
 0x20d   : > { %2036 = vmatpush3.bf16.msra.mxu0 %v795_v31 }
 0x20e   : > { %2037 = vmatprep.subr.bf16.mxu0 %v794_v39 }
 0x211   : > { %2038 = vmatpush3.bf16.msra.mxu0 %v794_v39 }
 0x212   : > { %2039 = vmatprep.subr.bf16.mxu0 %v2544_v37 }
 0x213   : > { %2002 = vmatpush3.bf16.xpose.msra.mxu1 %v862_v18 }
 0x214   : > { %2065 = vmatprep.subr.msk.bf16.mxu1 %vm824_vm4, %v787_v42 }
 0x215   : > { %2040 = vmatpush3.bf16.msra.mxu0 %v2544_v37  ;;  %v853_v37 = vsel %vm824_vm4, %v2541_v34, 0 }
 0x216   : > { %2041 = vmatprep.subr.bf16.mxu0 %v2536_v27 }
 0x219   : > { %2042 = vmatpush3.bf16.msra.mxu0 %v2536_v27  ;;  %v850_v27 = vsel %vm824_vm4, %v2533_v24, 0 }
 0x21b   : > { %2004 = vmatpush3.bf16.xpose.msra.mxu1 %v859_v38  ;;  %v2691_v38 = vld [vmem:[#allocation3 + $0x40] sm:$0xff] }
 0x21c   : > { %2066 = vmatprep.subr.msk.bf16.mxu1 %vm824_vm4, %v2550_v43  ;;  %v817_v43 = vpack.c.bf16 %v803_v45, %v802_v44 }
 0x223   : > { %2006 = vmatpush3.bf16.xpose.msra.mxu1 %v856_v16 }
 0x224   : > { %2067 = vmatprep.subr.msk.bf16.mxu1 %vm824_vm4, %v2541_v34  ;;  %v807_v34 = vld [vmem:[#allocation2 + $0x38] sm:$0xff] }
 0x225   : > { %v819_v52 = vpack.c.bf16 %v807_v34, %v806_v49  ;;  %v2709_v49 = vld [vmem:[#allocation3 + $0x48] sm:$0xff] }
 0x22b   : > { %2008 = vmatpush3.bf16.xpose.msra.mxu1 %v853_v37 }
 0x22c   : > { %2068 = vmatprep.subr.msk.bf16.mxu1 %vm824_vm4, %v2533_v24  ;;  %v810_v24 = vld [vmem:[#allocation2 + $0x50] sm:$0xff] }
 0x22d   : > { %v821_v57 = vpack.c.bf16 %v811_v54, %v810_v24 }
 0x233   : > { %2010 = vmatpush3.bf16.xpose.msra.mxu1 %v850_v27  ;;  %v2697_v27 = vld [vmem:[#allocation3 + $0x58] sm:$0xff] }
 0x23a   : > { %2012 = vmatmul.mubr.msk.bf16.vlgmr.msra.gmra.mxu1 %vm824_vm4, %v817_v43 }
 0x23b   : > { %2015 = vmatprep.mubr.msk.bf16.mxu1 %vm824_vm4, %v818_v48 }
 0x242   : > { %2016 = vmatmul.mubr.msk.bf16.gmra.mxu1 %vm824_vm4, %v819_v52  ;;  %v2715_v52 = vld [vmem:[#allocation3 + $0x60] sm:$0xff] }
 0x243   : > { %2019 = vmatprep.mubr.msk.bf16.mxu1 %vm824_vm4, %v820_v53 }
 0x24a   : > { %2020 = vmatmul.mubr.msk.bf16.gmra.mxu1 %vm824_vm4, %v821_v57 }
 0x24b   : > { %2023 = vmatprep.mubr.msk.bf16.mxu1 %vm824_vm4, %v822_v58 }
 0x252   : > { %2024 = vmatmul.mubr.msk.bf16.gmra.mxu1 %vm824_vm4, %v823_v61 }
 0x2fa   : > { %v2614_v62 = vpop.f32.mrf.mxu1 }
 0x2fb   : > { %990 = vmax.xlane.f32.xlu1 %v2614_v62 }
 0x2fc   : > { %v2617_v63 = vpop.f32.mrf.mxu1 }
 0x2fd   : > { %986 = vmax.xlane.f32.xlu0 %v2617_v63 }
 0x2fe   : > { %v2620_v0 = vpop.f32.mrf.mxu1 }
 0x2ff   : > { %992 = vmax.xlane.f32.xlu1 %v2620_v0 }
 0x300   : > { %v2623_v1 = vpop.f32.mrf.mxu1 }
 0x301   : > { %988 = vmax.xlane.f32.xlu0 %v2623_v1 }
 0x302   : > { %v2626_v2 = vpop.f32.mrf.mxu1 }
 0x304   : > { %v2628_v3 = vpop.f32.mrf.mxu1 }
 0x305   : > { %994 = vmax.xlane.f32.xlu0 %v2628_v3 }
 0x306   : > { %v2631_v4 = vpop.f32.mrf.mxu1 }
 0x307   : > { %1000 = vmax.xlane.f32.xlu1 %v2631_v4 }
 0x308   : > { %v2634_v5 = vpop.f32.mrf.mxu1 }
 0x309   : > { %998 = vmax.xlane.f32.xlu0 %v2626_v2 }
 0x30a   : > { %v2637_v6 = vpop.f32.mrf.mxu1 }
 0x30b   : > { %996 = vmax.xlane.f32.xlu1 %v2634_v5 }
 0x30c   : > { %v2640_v7 = vpop.f32.mrf.mxu1 }
 0x30d   : > { %1002 = vmax.xlane.f32.xlu0 %v2640_v7 }
 0x30e   : > { %v2643_v8 = vpop.f32.mrf.mxu1 }
 0x30f   : > { %1008 = vmax.xlane.f32.xlu1 %v2643_v8 }
 0x310   : > { %v2646_v9 = vpop.f32.mrf.mxu1 }
 0x311   : > { %1006 = vmax.xlane.f32.xlu0 %v2637_v6 }
 0x312   : > { %v2649_v10 = vpop.f32.mrf.mxu1 }
 0x313   : > { %1004 = vmax.xlane.f32.xlu1 %v2646_v9 }
 0x314   : > { %v2652_v11 = vpop.f32.mrf.mxu1 }
 0x315   : > { %1010 = vmax.xlane.f32.xlu0 %v2652_v11 }
 0x316   : > { %v2655_v12 = vpop.f32.mrf.mxu1 }
 0x317   : > { %1016 = vmax.xlane.f32.xlu1 %v2655_v12 }
 0x318   : > { %v2659_v13 = vpop.f32.mrf.mxu1 }
 0x319   : > { %1014 = vmax.xlane.f32.xlu0 %v2649_v10 }
 0x31b   : > { %1012 = vmax.xlane.f32.xlu1 %v2659_v13 }
 0x384   : > { %v991_v15 = vpop.xlane.xlu1 %990 }
 0x385   : > { %v2665_v19 = vmax.f32 %v2662_v14, %v991_v15 }
 0x386   : > { %v987_v20 = vpop.xlane.xlu0 %986 }
 0x387   : > { %1558 = vst.msk [vmem:[#allocation3 + $0x10] sm:$0xff] %vm1290_vm5, %v2665_v19  ;;  %v1018_v22 = vmax.f32 %v970_v17, %v987_v20  ;;  %1094 = vperm.xlu1 %2131, %v2665_v19   ;;  %v983_v20 = vld [vmem:[#allocation3 + $0x68] sm:$0xff] }
 0x388   : > { %v993_v23 = vpop.xlane.xlu1 %992 }
 0x389   : > { %1556 = vst.msk [vmem:[#allocation3] sm:$0xff] %vm1290_vm5, %v1018_v22  ;;  %v1021_v26 = vmax.f32 %v973_v21, %v993_v23  ;;  %1084 = vperm.xlu0 %2130, %v1018_v22   ;;  %v1034_v47 = vsub.f32 %v970_v17, %v1018_v22 }
 0x38a   : > { %v989_v28 = vpop.xlane.xlu0 %988 }
 0x38b   : > { %1559 = vst.msk [vmem:[#allocation3 + $0x18] sm:$0xff] %vm1290_vm5, %v1021_v26  ;;  %v1019_v29 = vmax.f32 %v2670_v25, %v989_v28  ;;  %1099 = vperm.xlu1 %2131, %v1021_v26   ;;  %v1037_v50 = vsub.f32 %v973_v21, %v1021_v26  ;;  %v1050_v53 = vmul.f32 1.442695, %v1034_v47  ;;  %v1036_v21 = vsub.f32 %v2662_v14, %v2665_v19 }
 0x38d   : > { %1557 = vst.msk [vmem:[#allocation3 + $0x8] sm:$0xff] %vm1290_vm5, %v1019_v29  ;;  %v1035_v56 = vsub.f32 %v2670_v25, %v1019_v29  ;;  %v1056_v58 = vmul.f32 1.442695, %v1037_v50  ;;  %2143 = vpow2.f32 %v1050_v53  ;;  %v1054_v19 = vmul.f32 1.442695, %v1036_v21 }
 0x38e   : > { %v995_v31 = vpop.xlane.xlu0 %994 }
 0x38f   : > { %v2679_v33 = vmax.f32 %v2675_v30, %v995_v31  ;;  %1089 = vperm.xlu1 %2131, %v1019_v29   ;;  %v1052_v22 = vmul.f32 1.442695, %v1035_v56  ;;  %2145 = vpow2.f32 %v1056_v58 }
 0x390   : > { %v1001_v35 = vpop.xlane.xlu1 %1000 }
 0x391   : > { %1560 = vst.msk [vmem:[#allocation3 + $0x20] sm:$0xff] %vm1290_vm5, %v2679_v33  ;;  %v1025_v39 = vmax.f32 %v977_v32, %v1001_v35  ;;  %2147 = vpow2.f32 %v1052_v22 }
 0x392   : > { %v999_v40 = vpop.xlane.xlu0 %998 }
 0x393   : > { %1563 = vst.msk [vmem:[#allocation3 + $0x38] sm:$0xff] %vm1290_vm5, %v1025_v39  ;;  %v2689_v42 = vmax.f32 %v2681_v36, %v999_v40  ;;  %v1041_v61 = vsub.f32 %v977_v32, %v1025_v39  ;;  %v1038_v32 = vsub.f32 %v2675_v30, %v2679_v33 }
 0x394   : > { %v997_v18 = vpop.xlane.xlu1 %996 }
 0x395   : > { %1562 = vst.msk [vmem:[#allocation3 + $0x30] sm:$0xff] %vm1290_vm5, %v2689_v42  ;;  %v1023_v16 = vmax.f32 %v2685_v41, %v997_v18  ;;  %1114 = vperm.xlu1 %2131, %v2689_v42   ;;  %v1064_v28 = vmul.f32 1.442695, %v1041_v61  ;;  %v1058_v40 = vmul.f32 1.442695, %v1038_v32 }
 0x396   : > { %v1003_v37 = vpop.xlane.xlu0 %1002 }
 0x397   : > { %1561 = vst.msk [vmem:[#allocation3 + $0x28] sm:$0xff] %vm1290_vm5, %v1023_v16  ;;  %v2701_v44 = vmax.f32 %v2691_v38, %v1003_v37  ;;  %v1039_v29 = vsub.f32 %v2685_v41, %v1023_v16  ;;  %2149 = vpow2.f32 %v1064_v28  ;;  %v1040_v41 = vsub.f32 %v2681_v36, %v2689_v42 }
 0x398   : > { %v1009_v45 = vpop.xlane.xlu1 %1008  ;;  %2151 = vpow2.f32 %v1054_v19 }
 0x399   : > { %1564 = vst.msk [vmem:[#allocation3 + $0x40] sm:$0xff] %vm1290_vm5, %v2701_v44  ;;  %v1029_v43 = vmax.f32 %v2697_v27, %v1009_v45  ;;  %1104 = vperm.xlu1 %2131, %v2679_v33   ;;  %v1060_v35 = vmul.f32 1.442695, %v1039_v29  ;;  %v1042_v45 = vsub.f32 %v2691_v38, %v2701_v44 }
 0x39a   : > { %v1007_v48 = vpop.xlane.xlu0 %1006  ;;  %v2759_v33 = vpop.eup %2143 }
 0x39b   : > { %1567 = vst.msk [vmem:[#allocation3 + $0x58] sm:$0xff] %vm1290_vm5, %v1029_v43  ;;  %v2713_v34 = vmax.f32 %v2703_v46, %v1007_v48  ;;  %2153 = vpow2.f32 %v1060_v35 }
 0x39c   : > { %v1005_v51 = vpop.xlane.xlu1 %1004  ;;  %2155 = vpow2.f32 %v1058_v40 }
 0x39d   : > { %1566 = vst.msk [vmem:[#allocation3 + $0x50] sm:$0xff] %vm1290_vm5, %v2713_v34  ;;  %v1027_v24 = vmax.f32 %v2709_v49, %v1005_v51  ;;  %1109 = vperm.xlu1 %2131, %v1023_v16   ;;  %v1062_v16 = vmul.f32 1.442695, %v1040_v41  ;;  %v1044_v37 = vsub.f32 %v2703_v46, %v2713_v34 }
 0x39e   : > { %v1011_v54 = vpop.xlane.xlu0 %1010 }
 0x39f   : > { %1565 = vst.msk [vmem:[#allocation3 + $0x48] sm:$0xff] %vm1290_vm5, %v1027_v24  ;;  %v2725_v57 = vmax.f32 %v2715_v52, %v1011_v54  ;;  %1129 = vperm.xlu0 %2130, %v1027_v24   ;;  %v1043_v30 = vsub.f32 %v2709_v49, %v1027_v24  ;;  %v1070_v47 = vmul.f32 1.442695, %v1044_v37  ;;  %v1066_v49 = vmul.f32 1.442695, %v1042_v45 }
 0x3a0   : > { %v1017_v59 = vpop.xlane.xlu1 %1016 }
 0x3a1   : > { %1568 = vst.msk [vmem:[#allocation3 + $0x60] sm:$0xff] %vm1290_vm5, %v2725_v57  ;;  %v2732_v15 = vmax.f32 %v2720_v55, %v1017_v59  ;;  %1119 = vperm.xlu1 %2131, %v1025_v39   ;;  %v1045_v39 = vsub.f32 %v2697_v27, %v1029_v43  ;;  %v2764_v27 = vpop.eup %2145  ;;  %v1068_v36 = vmul.f32 1.442695, %v1043_v30 }
 0x3a2   : > { %v1015_v17 = vpop.xlane.xlu0 %1014 }
 0x3a3   : > { %v1049_v23 = vsub.f32 %v2720_v55, %v2732_v15  ;;  %1571 = vst.msk [vmem:[#allocation3 + $0x78] sm:$0xff] %vm1290_vm5, %v2732_v15  ;;  %v2741_v25 = vmax.f32 %v2727_v60, %v1015_v17  ;;  %1139 = vperm.xlu0 %2130, %v1029_v43   ;;  %v1072_v18 = vmul.f32 1.442695, %v1045_v39  ;;  %v2770_v43 = vpop.eup %2147 }
 0x3a4   : > { %v1013_v26 = vpop.xlane.xlu1 %1012  ;;  %v2773_v48 = vpop.eup %2149 }
 0x3a5   : > { %v1048_v31 = vsub.f32 %v2727_v60, %v2741_v25  ;;  %1570 = vst.msk [vmem:[#allocation3 + $0x70] sm:$0xff] %vm1290_vm5, %v2741_v25  ;;  %v1031_v14 = vmax.f32 %v983_v20, %v1013_v26  ;;  %1124 = vperm.xlu1 %2131, %v2701_v44   ;;  %2157 = vpow2.f32 %v1072_v18  ;;  %v2778_v50 = vpop.eup %2151 }
 0x3a6   : > { %2159 = vpow2.f32 %v1062_v16 }
 0x3a7   : > { %1569 = vst.msk [vmem:[#allocation3 + $0x68] sm:$0xff] %vm1290_vm5, %v1031_v14  ;;  %1149 = vperm.xlu0 %2130, %v1031_v14   ;;  %v1047_v42 = vsub.f32 %v983_v20, %v1031_v14  ;;  %2161 = vpow2.f32 %v1068_v36 }
 0x3a8   : > { %2163 = vpow2.f32 %v1070_v47  ;;  %v2781_v38 = vpop.eup %2153 }
 0x3a9   : > { %1134 = vperm.xlu1 %2131, %v2713_v34   ;;  %v1076_v46 = vmul.f32 1.442695, %v1047_v42  ;;  %v1046_v34 = vsub.f32 %v2715_v52, %v2725_v57  ;;  %v2784_v51 = vpop.eup %2155 }
 0x3ab   : > { %1159 = vperm.xlu0 %2130, %v2732_v15   ;;  %2165 = vpow2.f32 %v1076_v46  ;;  %v1074_v44 = vmul.f32 1.442695, %v1046_v34 }
 0x3ac   : > { %2167 = vpow2.f32 %v1066_v49 }
 0x3ad   : > { %1144 = vperm.xlu1 %2131, %v2725_v57   ;;  %2169 = vpow2.f32 %v1074_v44 }
 0x3af   : > { %1325 = vperm.xlu0 %2130, %v2759_v33  }
 0x3b1   : > { %1154 = vperm.xlu1 %2131, %v2741_v25  }
 0x3b2   : > { %v2787_v53 = vpop.eup %2157 }
 0x3b3   : > { %1340 = vperm.xlu0 %2130, %v2764_v27   ;;  %v2790_v52 = vpop.eup %2159 }
 0x3b4   : > { %v2793_v24 = vpop.eup %2161 }
 0x3b5   : > { %1330 = vperm.xlu1 %2131, %v2770_v43   ;;  %v2796_v54 = vpop.eup %2163 }
 0x3b7   : > { %1360 = vperm.xlu0 %2130, %v2773_v48  }
 0x3b8   : > { %v2799_v56 = vpop.eup %2165 }
 0x3b9   : > { %1335 = vperm.xlu1 %2131, %v2778_v50   ;;  %v2802_v57 = vpop.eup %2167 }
 0x3ba   : > { %v2805_v58 = vpop.eup %2169 }
 0x3bb   : > { %1350 = vperm.xlu0 %2130, %v2781_v38  }
 0x3bd   : > { %1345 = vperm.xlu1 %2131, %v2784_v51  }
 0x3bf   : > { %1380 = vperm.xlu0 %2130, %v2787_v53  }
 0x3c1   : > { %1355 = vperm.xlu1 %2131, %v2790_v52  }
 0x3c3   : > { %1370 = vperm.xlu0 %2130, %v2793_v24  }
 0x3c5   : > { %1375 = vperm.xlu1 %2131, %v2796_v54  }
 0x3c7   : > { %1390 = vperm.xlu0 %2130, %v2799_v56  }
 0x3c9   : > { %1365 = vperm.xlu1 %2131, %v2802_v57  }
 0x3cd   : > { %1385 = vperm.xlu1 %2131, %v2805_v58  }
 0x402   : > { %v1095_v59 = vpop.permute.xlu1 %1094 }
 0x403   : > { %v1164_v61 = vsub.f32 %v2614_v62, %v1095_v59 }
 0x404   : > { %v1085_v17 = vpop.permute.xlu0 %1084 }
 0x405   : > { %v1182_v20 = vmul.f32 1.442695, %v1164_v61  ;;  %v1162_v21 = vsub.f32 %v2617_v63, %v1085_v17 }
 0x406   : > { %v1100_v22 = vpop.permute.xlu1 %1099 }
 0x407   : > { %2171 = vpow2.f32 %v1182_v20  ;;  %v1178_v26 = vmul.f32 1.442695, %v1162_v21  ;;  %v1165_v28 = vsub.f32 %v2620_v0, %v1100_v22 }
 0x409   : > { %2173 = vpow2.f32 %v1178_v26  ;;  %v1184_v29 = vmul.f32 1.442695, %v1165_v28 }
 0x40a   : > { %v1090_v14 = vpop.permute.xlu1 %1089 }
 0x40b   : > { %v1163_v19 = vsub.f32 %v2623_v1, %v1090_v14  ;;  %2175 = vpow2.f32 %v1184_v29 }
 0x40d   : > { %v1180_v32 = vmul.f32 1.442695, %v1163_v19 }
 0x40f   : > { %2177 = vpow2.f32 %v1180_v32 }
 0x410   : > { %v1115_v35 = vpop.permute.xlu1 %1114 }
 0x411   : > { %v1168_v62 = vsub.f32 %v2626_v2, %v1115_v35 }
 0x413   : > { %v1190_v39 = vmul.f32 1.442695, %v1168_v62 }
 0x414   : > { %v2172_v40 = vpop.eup %2171  ;;  %v1105_v41 = vpop.permute.xlu1 %1104 }
 0x415   : > { %2179 = vpow2.f32 %v1190_v39  ;;  %v1166_v63 = vsub.f32 %v2628_v3, %v1105_v41  ;;  %1246 = vadd.xlane.f32.xlu0 %v2172_v40 }
 0x416   : > { %v2174_v18 = vpop.eup %2173 }
 0x417   : > { %v1186_v0 = vmul.f32 1.442695, %v1166_v63  ;;  %1242 = vadd.xlane.f32.xlu1 %v2174_v18 }
 0x418   : > { %v1110_v30 = vpop.permute.xlu1 %1109  ;;  %v2176_v16 = vpop.eup %2175 }
 0x419   : > { %2181 = vpow2.f32 %v1186_v0  ;;  %v1167_v1 = vsub.f32 %v2634_v5, %v1110_v30  ;;  %v1420_v49 = vpack.c.bf16 %v2176_v16, %v2172_v40 }
 0x41a   : > { %v1130_v37 = vpop.permute.xlu0 %1129 }
 0x41b   : > { %v1188_v36 = vmul.f32 1.442695, %v1167_v1  ;;  %1248 = vadd.xlane.f32.xlu1 %v2176_v16  ;;  %v1171_v2 = vsub.f32 %v2646_v9, %v1130_v37 }
 0x41c   : > { %v2178_v42 = vpop.eup %2177  ;;  %v1120_v45 = vpop.permute.xlu1 %1119 }
 0x41d   : > { %2183 = vpow2.f32 %v1188_v36  ;;  %v1169_v47 = vsub.f32 %v2631_v4, %v1120_v45  ;;  %1244 = vadd.xlane.f32.xlu0 %v2178_v42  ;;  %v1419_v3 = vpack.c.bf16 %v2178_v42, %v2174_v18  ;;  %v1196_v44 = vmul.f32 1.442695, %v1171_v2 }
 0x41e   : > { %v1140_v46 = vpop.permute.xlu0 %1139 }
 0x41f   : > { %v1192_v34 = vmul.f32 1.442695, %v1169_v47  ;;  %2043 = vmatprep.mubr.bf16.mxu0 %v1419_v3  ;;  %v1173_v5 = vsub.f32 %v2643_v8, %v1140_v46  ;;  %v1078_v47 = vmul.f32 1.442695, %v1048_v31  ;;  %v1080_v3 = vmul.f32 1.442695, %v1049_v23 }
 0x420   : > { %2044 = vmatmul.mubr.bf16.vlgmr.msra.gmra.mxu0 %v1420_v49  ;;  %v1125_v59 = vpop.permute.xlu1 %1124 }
 0x421   : > { %2185 = vpow2.f32 %v1192_v34  ;;  %v1170_v61 = vsub.f32 %v2640_v7, %v1125_v59  ;;  %v1200_v4 = vmul.f32 1.442695, %v1173_v5 }
 0x422   : > { %v2180_v17 = vpop.eup %2179  ;;  %v1150_v9 = vpop.permute.xlu0 %1149  ;;  %2187 = vpow2.f32 %v1196_v44 }
 0x423   : > { %v1194_v20 = vmul.f32 1.442695, %v1170_v61  ;;  %1254 = vadd.xlane.f32.xlu0 %v2180_v17  ;;  %v1175_v21 = vsub.f32 %v2659_v13, %v1150_v9 }
 0x424   : > { %v1135_v22 = vpop.permute.xlu1 %1134 }
 0x425   : > { %2189 = vpow2.f32 %v1194_v20  ;;  %v1172_v26 = vsub.f32 %v2637_v6, %v1135_v22  ;;  %v1204_v14 = vmul.f32 1.442695, %v1175_v21  ;;  %v1212_v20 = vld [vmem:[#allocation4 + $0x10] sm:$0xff]  ;;  %v1210_v21 = vld [vmem:[#allocation4] sm:$0xff] }
 0x426   : > { %v2182_v28 = vpop.eup %2181  ;;  %v1160_v29 = vpop.permute.xlu0 %1159  ;;  %2191 = vpow2.f32 %v1200_v4  ;;  %v1228_v22 = vmul.f32 %v2778_v50, %v1212_v20 }
 0x427   : > { %v1198_v8 = vmul.f32 1.442695, %v1172_v26  ;;  %1250 = vadd.xlane.f32.xlu0 %v2182_v28  ;;  %v1177_v7 = vsub.f32 %v2655_v12, %v1160_v29  ;;  %v1226_v29 = vmul.f32 %v2759_v33, %v1210_v21 }
 0x428   : > { %v1145_v19 = vpop.permute.xlu1 %1144 }
 0x429   : > { %2193 = vpow2.f32 %v1198_v8  ;;  %v1174_v32 = vsub.f32 %v2652_v11, %v1145_v19  ;;  %v1208_v13 = vmul.f32 1.442695, %v1177_v7  ;;  %v1211_v19 = vld [vmem:[#allocation4 + $0x8] sm:$0xff] }
 0x42a   : > { %v2184_v35 = vpop.eup %2183  ;;  %2195 = vpow2.f32 %v1204_v14  ;;  %v2836_v34 = vpop.permute.xlu0 %1325  ;;  %v1213_v14 = vld [vmem:[#allocation4 + $0x18] sm:$0xff] }
 0x42b   : > { %v1202_v62 = vmul.f32 1.442695, %v1174_v32  ;;  %v1421_v39 = vpack.c.bf16 %v2184_v35, %v2182_v28  ;;  %v1229_v32 = vmul.f32 %v2764_v27, %v1213_v14 }
 0x42c   : > { %v1155_v40 = vpop.permute.xlu1 %1154 }
 0x42d   : > { %2197 = vpow2.f32 %v1202_v62  ;;  %v1176_v6 = vsub.f32 %v2649_v10, %v1155_v40  ;;  %2047 = vmatprep.mubr.bf16.mxu0 %v1421_v39  ;;  %v1227_v39 = vmul.f32 %v2770_v43, %v1211_v19  ;;  %v1216_v40 = vld [vmem:[#allocation4 + $0x30] sm:$0xff]  ;;  %v1217_v43 = vld [vmem:[#allocation4 + $0x38] sm:$0xff] }
 0x42e   : > { %v2186_v41 = vpop.eup %2185  ;;  %2199 = vpow2.f32 %v1208_v13  ;;  %v2840_v25 = vpop.permute.xlu0 %1340  ;;  %v1232_v33 = vmul.f32 %v2790_v52, %v1216_v40 }
 0x42f   : > { %v1206_v63 = vmul.f32 1.442695, %v1176_v6  ;;  %1256 = vadd.xlane.f32.xlu1 %v2186_v41  ;;  %v1422_v18 = vpack.c.bf16 %v2186_v41, %v2180_v17  ;;  %v2188_v12 = vpop.eup %2187  ;;  %v1214_v41 = vld [vmem:[#allocation4 + $0x20] sm:$0xff] }
 0x430   : > { %v2838_v60 = vpop.permute.xlu1 %1330  ;;  %v1230_v27 = vmul.f32 %v2784_v51, %v1214_v41  ;;  %v1310_v41 = vld [vmem:[#allocation5 + $0x18] sm:$0xff] }
 0x431   : > { %2201 = vpow2.f32 %v1206_v63  ;;  %2048 = vmatmul.mubr.bf16.gmra.mxu0 %v1422_v18 }
 0x432   : > { %v2190_v0 = vpop.eup %2189  ;;  %2203 = vpow2.f32 %v1078_v47  ;;  %v2844_v44 = vpop.permute.xlu0 %1360  ;;  %v1219_v47 = vld [vmem:[#allocation4 + $0x48] sm:$0xff] }
 0x433   : > { %1252 = vadd.xlane.f32.xlu1 %v2184_v35  ;;  %v1423_v11 = vpack.c.bf16 %v2188_v12, %v2190_v0  ;;  %v2192_v30 = vpop.eup %2191  ;;  %2205 = vpow2.f32 %v1080_v3  ;;  %v1235_v21 = vmul.f32 %v2793_v24, %v1219_v47 }
 0x434   : > { %v2842_v31 = vpop.permute.xlu1 %1335 }
 0x435   : > { %2051 = vmatprep.mubr.bf16.mxu0 %v1423_v11 }
 0x436   : > { %v2194_v1 = vpop.eup %2193  ;;  %v2848_v15 = vpop.permute.xlu0 %1350 }
 0x437   : > { %1264 = vadd.xlane.f32.xlu1 %v2192_v30  ;;  %1262 = vadd.xlane.f32.xlu0 %v2194_v1  ;;  %v1424_v16 = vpack.c.bf16 %v2192_v30, %v2194_v1  ;;  %v2196_v37 = vpop.eup %2195  ;;  %v1215_v30 = vld [vmem:[#allocation4 + $0x28] sm:$0xff] }
 0x438   : > { %v2846_v55 = vpop.permute.xlu1 %1345  ;;  %v1231_v52 = vmul.f32 %v2781_v38, %v1215_v30 }
 0x439   : > { %2052 = vmatmul.mubr.bf16.gmra.mxu0 %v1424_v16 }
 0x43a   : > { %v2198_v10 = vpop.eup %2197  ;;  %v2852_v5 = vpop.permute.xlu0 %1380 }
 0x43b   : > { %1260 = vadd.xlane.f32.xlu1 %v2188_v12  ;;  %1258 = vadd.xlane.f32.xlu0 %v2190_v0  ;;  %v1425_v36 = vpack.c.bf16 %v2196_v37, %v2198_v10  ;;  %v2200_v42 = vpop.eup %2199  ;;  %v1233_v0 = vmul.f32 %v2773_v48, %v1217_v43  ;;  %v1218_v48 = vld [vmem:[#allocation4 + $0x40] sm:$0xff] }
 0x43c   : > { %v2850_v23 = vpop.permute.xlu1 %1355  ;;  %v1234_v38 = vmul.f32 %v2802_v57, %v1218_v48  ;;  %v1223_v57 = vld [vmem:[#allocation4 + $0x68] sm:$0xff] }
 0x43d   : > { %2055 = vmatprep.mubr.bf16.mxu0 %v1425_v36 }
 0x43e   : > { %v2202_v2 = vpop.eup %2201  ;;  %v2856_v61 = vpop.permute.xlu0 %1370 }
 0x43f   : > { %1272 = vadd.xlane.f32.xlu1 %v2200_v42  ;;  %1270 = vadd.xlane.f32.xlu0 %v2202_v2  ;;  %v1426_v45 = vpack.c.bf16 %v2200_v42, %v2202_v2  ;;  %v2830_v46 = vpop.eup %2203 }
 0x440   : > { %v2833_v49 = vpop.eup %2205  ;;  %v2854_v59 = vpop.permute.xlu1 %1375 }
 0x441   : > { %2056 = vmatmul.mubr.bf16.gmra.mxu0 %v1426_v45 }
 0x442   : > { %v2860_v9 = vpop.permute.xlu0 %1390 }
 0x443   : > { %1268 = vadd.xlane.f32.xlu1 %v2196_v37  ;;  %1266 = vadd.xlane.f32.xlu0 %v2198_v10  ;;  %v1220_v37 = vld [vmem:[#allocation4 + $0x50] sm:$0xff]  ;;  %v1221_v10 = vld [vmem:[#allocation4 + $0x58] sm:$0xff] }
 0x444   : > { %v2858_v17 = vpop.permute.xlu1 %1365  ;;  %v1236_v51 = vmul.f32 %v2796_v54, %v1220_v37  ;;  %v1237_v42 = vmul.f32 %v2787_v53, %v1221_v10  ;;  %v1225_v54 = vld [vmem:[#allocation4 + $0x78] sm:$0xff] }
 0x445   : > { %v1241_v14 = vmul.f32 %v2833_v49, %v1225_v54 }
 0x448   : > { %v2862_v4 = vpop.permute.xlu1 %1385 }
 0x454   : > { %1395 = vperm.xlu1 %2131, %v2830_v46  }
 0x459   : > { %1400 = vperm.xlu0 %2130, %v2833_v49   ;;  %v1309_v49 = vld [vmem:[#allocation5 + $0x10] sm:$0xff] }
 0x49e   : > { %v1247_v26 = vpop.xlane.xlu0 %1246 }
 0x49f   : > { %v1276_v28 = vadd.f32 %v1247_v26, %v1228_v22 }
 0x4a0   : > { %v1243_v8 = vpop.xlane.xlu1 %1242 }
 0x4a1   : > { %1293 = vst.msk [vmem:[#allocation4 + $0x10] sm:$0xff] %vm1290_vm5, %v1276_v28  ;;  %v1274_v7 = vadd.f32 %v1243_v8, %v1226_v29  ;;  %v1224_v28 = vld [vmem:[#allocation4 + $0x70] sm:$0xff] }
 0x4a2   : > { %v1240_v8 = vmul.f32 %v2830_v46, %v1224_v28  ;;  %v1316_v28 = vld [vmem:[#allocation5 + $0x48] sm:$0xff] }
 0x4a3   : > { %1291 = vst.msk [vmem:[#allocation4] sm:$0xff] %vm1290_vm5, %v1274_v7 }
 0x4a4   : > { %v1249_v35 = vpop.xlane.xlu1 %1248 }
 0x4a5   : > { %v1277_v62 = vadd.f32 %v1249_v35, %v1229_v32  ;;  %v1222_v32 = vld [vmem:[#allocation4 + $0x60] sm:$0xff] }
 0x4a6   : > { %v1245_v13 = vpop.xlane.xlu0 %1244 }
 0x4a7   : > { %1294 = vst.msk [vmem:[#allocation4 + $0x18] sm:$0xff] %vm1290_vm5, %v1277_v62  ;;  %v1275_v50 = vadd.f32 %v1245_v13, %v1227_v39  ;;  %v1238_v62 = vmul.f32 %v2805_v58, %v1222_v32  ;;  %v1239_v39 = vmul.f32 %v2799_v56, %v1223_v57  ;;  %v1308_v58 = vld [vmem:[#allocation5 + $0x8] sm:$0xff]  ;;  %v1406_v56 = vmul.f32 %v2840_v25, %v1310_v41  ;;  %v1314_v25 = vld [vmem:[#allocation5 + $0x38] sm:$0xff] }
 0x4a9   : > { %1292 = vst.msk [vmem:[#allocation4 + $0x8] sm:$0xff] %vm1290_vm5, %v1275_v50 }
 0x4ac   : > { %v1255_v6 = vpop.xlane.xlu0 %1254 }
 0x4ad   : > { %v1280_v63 = vadd.f32 %v1255_v6, %v1232_v33  ;;  %v1307_v33 = vld [vmem:[#allocation5] sm:$0xff]  ;;  %v1405_v6 = vmul.f32 %v2842_v31, %v1309_v49 }
 0x4af   : > { %1297 = vst.msk [vmem:[#allocation4 + $0x30] sm:$0xff] %vm1290_vm5, %v1280_v63 }
 0x4b0   : > { %v1251_v18 = vpop.xlane.xlu0 %1250 }
 0x4b1   : > { %v1278_v12 = vadd.f32 %v1251_v18, %v1230_v27  ;;  %v1403_v27 = vmul.f32 %v2836_v34, %v1307_v33  ;;  %v1313_v34 = vld [vmem:[#allocation5 + $0x30] sm:$0xff] }
 0x4b3   : > { %1295 = vst.msk [vmem:[#allocation4 + $0x20] sm:$0xff] %vm1290_vm5, %v1278_v12 }
 0x4b8   : > { %v1257_v11 = vpop.xlane.xlu1 %1256 }
 0x4b9   : > { %v1281_v1 = vadd.f32 %v1257_v11, %v1233_v0  ;;  %v1404_v11 = vmul.f32 %v2838_v60, %v1308_v58 }
 0x4bb   : > { %1298 = vst.msk [vmem:[#allocation4 + $0x38] sm:$0xff] %vm1290_vm5, %v1281_v1 }
 0x4bc   : > { %v1253_v16 = vpop.xlane.xlu1 %1252 }
 0x4bd   : > { %v1279_v36 = vadd.f32 %v1253_v16, %v1231_v52  ;;  %v1311_v52 = vld [vmem:[#allocation5 + $0x20] sm:$0xff]  ;;  %v1409_v16 = vmul.f32 %v2850_v23, %v1313_v34 }
 0x4be   : > { %v1407_v10 = vmul.f32 %v2846_v55, %v1311_v52  ;;  %v1315_v23 = vld [vmem:[#allocation5 + $0x40] sm:$0xff] }
 0x4bf   : > { %1296 = vst.msk [vmem:[#allocation4 + $0x28] sm:$0xff] %vm1290_vm5, %v1279_v36 }
 0x4c0   : > { %v1263_v2 = vpop.xlane.xlu0 %1262  ;;  %v1265_v45 = vpop.xlane.xlu1 %1264 }
 0x4c1   : > { %v1284_v3 = vadd.f32 %v1263_v2, %v1236_v51  ;;  %v1285_v20 = vadd.f32 %v1265_v45, %v1237_v42  ;;  %v1312_v51 = vld [vmem:[#allocation5 + $0x28] sm:$0xff]  ;;  %v1410_v42 = vmul.f32 %v2844_v44, %v1314_v25  ;;  %v1317_v45 = vld [vmem:[#allocation5 + $0x50] sm:$0xff]  ;;  %v1411_v44 = vmul.f32 %v2858_v17, %v1315_v23 }
 0x4c2   : > { %v1408_v47 = vmul.f32 %v2848_v15, %v1312_v51 }
 0x4c3   : > { %1301 = vst.msk [vmem:[#allocation4 + $0x50] sm:$0xff] %vm1290_vm5, %v1284_v3  ;;  %1302 = vst.msk [vmem:[#allocation4 + $0x58] sm:$0xff] %vm1290_vm5, %v1285_v20 }
 0x4c4   : > { %v1259_v22 = vpop.xlane.xlu0 %1258  ;;  %v1261_v26 = vpop.xlane.xlu1 %1260 }
 0x4c5   : > { %v1282_v29 = vadd.f32 %v1259_v22, %v1234_v38  ;;  %v1283_v53 = vadd.f32 %v1261_v26, %v1235_v21  ;;  %v1413_v38 = vmul.f32 %v2854_v59, %v1317_v45  ;;  %v1318_v21 = vld [vmem:[#allocation5 + $0x58] sm:$0xff] }
 0x4c6   : > { %v1414_v15 = vmul.f32 %v2852_v5, %v1318_v21 }
 0x4c7   : > { %1299 = vst.msk [vmem:[#allocation4 + $0x40] sm:$0xff] %vm1290_vm5, %v1282_v29  ;;  %1300 = vst.msk [vmem:[#allocation4 + $0x48] sm:$0xff] %vm1290_vm5, %v1283_v53  ;;  %v1321_v53 = vld [vmem:[#allocation5 + $0x70] sm:$0xff] }
 0x4c8   : > { %v1271_v7 = vpop.xlane.xlu0 %1270  ;;  %v1273_v19 = vpop.xlane.xlu1 %1272 }
 0x4c9   : > { %v1288_v35 = vadd.f32 %v1271_v7, %v1240_v8  ;;  %v1289_v24 = vadd.f32 %v1273_v19, %v1241_v14  ;;  %v1412_v14 = vmul.f32 %v2856_v61, %v1316_v28  ;;  %v1319_v19 = vld [vmem:[#allocation5 + $0x60] sm:$0xff] }
 0x4cb   : > { %1305 = vst.msk [vmem:[#allocation4 + $0x70] sm:$0xff] %vm1290_vm5, %v1288_v35  ;;  %1306 = vst.msk [vmem:[#allocation4 + $0x78] sm:$0xff] %vm1290_vm5, %v1289_v24  ;;  %v1322_v35 = vld [vmem:[#allocation5 + $0x78] sm:$0xff] }
 0x4cc   : > { %v1267_v13 = vpop.xlane.xlu0 %1266  ;;  %v1269_v50 = vpop.xlane.xlu1 %1268 }
 0x4cd   : > { %v1286_v40 = vadd.f32 %v1267_v13, %v1238_v62  ;;  %v1287_v46 = vadd.f32 %v1269_v50, %v1239_v39  ;;  %v1415_v62 = vmul.f32 %v2862_v4, %v1319_v19  ;;  %v1320_v13 = vld [vmem:[#allocation5 + $0x68] sm:$0xff] }
 0x4ce   : > { %v1416_v49 = vmul.f32 %v2860_v9, %v1320_v13 }
 0x4cf   : > { %1303 = vst.msk [vmem:[#allocation4 + $0x60] sm:$0xff] %vm1290_vm5, %v1286_v40  ;;  %1304 = vst.msk [vmem:[#allocation4 + $0x68] sm:$0xff] %vm1290_vm5, %v1287_v46 }
 0x4d0   : > { %v1396_v8 = vpop.permute.xlu1 %1395 }
 0x4d1   : > { %v1417_v32 = vmul.f32 %v1396_v8, %v1321_v53 }
 0x4d4   : > { %v1401_v24 = vpop.permute.xlu0 %1400 }
 0x4d5   : > { %v1418_v61 = vmul.f32 %v1401_v24, %v1322_v35 }
 0x4e0   : > { %v2045_v63 = vpop.f32.mrf.mxu0 }
 0x4e1   : > { %v1526_v18 = vadd.f32 %v2045_v63, %v1405_v6 }
 0x4e2   : > { %v1461_v12 = vpop.f32.mrf.mxu0 }
 0x4e3   : > { %1542 = vst.msk [vmem:[#allocation5 + $0x10] sm:$0xff] %vm646_vm3, %v1526_v18  ;;  %v1524_v43 = vadd.f32 %v1461_v12, %v1403_v27 }
 0x4e4   : > { %v2046_v0 = vpop.f32.mrf.mxu0 }
 0x4e5   : > { %1540 = vst.msk [vmem:[#allocation5] sm:$0xff] %vm646_vm3, %v1524_v43  ;;  %v1527_v30 = vadd.f32 %v2046_v0, %v1406_v56 }
 0x4e6   : > { %v1464_v1 = vpop.f32.mrf.mxu0 }
 0x4e7   : > { %1543 = vst.msk [vmem:[#allocation5 + $0x18] sm:$0xff] %vm646_vm3, %v1527_v30  ;;  %v1525_v31 = vadd.f32 %v1464_v1, %v1404_v11 }
 0x4e9   : > { %1541 = vst.msk [vmem:[#allocation5 + $0x8] sm:$0xff] %vm646_vm3, %v1525_v31 }
 0x4f1   : > { %v2049_v37 = vpop.f32.mrf.mxu0 }
 0x4f2   : > { %v1530_v36 = vadd.f32 %v2049_v37, %v1409_v16 }
 0x4f3   : > { %v1477_v60 = vpop.f32.mrf.mxu0 }
 0x4f4   : > { %1546 = vst.msk [vmem:[#allocation5 + $0x30] sm:$0xff] %vm646_vm3, %v1530_v36  ;;  %v1528_v2 = vadd.f32 %v1477_v60, %v1407_v10 }
 0x4f5   : > { %v2050_v48 = vpop.f32.mrf.mxu0 }
 0x4f6   : > { %1544 = vst.msk [vmem:[#allocation5 + $0x20] sm:$0xff] %vm646_vm3, %v1528_v2  ;;  %v1531_v3 = vadd.f32 %v2050_v48, %v1410_v42 }
 0x4f7   : > { %v1480_v20 = vpop.f32.mrf.mxu0 }
 0x4f8   : > { %1547 = vst.msk [vmem:[#allocation5 + $0x38] sm:$0xff] %vm646_vm3, %v1531_v3  ;;  %v1529_v55 = vadd.f32 %v1480_v20, %v1408_v47 }
 0x4f9   : > { %v2053_v22 = vpop.f32.mrf.mxu0 }
 0x4fa   : > { %1545 = vst.msk [vmem:[#allocation5 + $0x28] sm:$0xff] %vm646_vm3, %v1529_v55  ;;  %v1534_v26 = vadd.f32 %v2053_v22, %v1413_v38 }
 0x4fb   : > { %v1493_v54 = vpop.f32.mrf.mxu0 }
 0x4fc   : > { %1550 = vst.msk [vmem:[#allocation5 + $0x50] sm:$0xff] %vm646_vm3, %v1534_v26  ;;  %v1532_v29 = vadd.f32 %v1493_v54, %v1411_v44 }
 0x4fd   : > { %v2054_v59 = vpop.f32.mrf.mxu0 }
 0x4fe   : > { %1548 = vst.msk [vmem:[#allocation5 + $0x40] sm:$0xff] %vm646_vm3, %v1532_v29  ;;  %v1535_v7 = vadd.f32 %v2054_v59, %v1414_v15 }
 0x4ff   : > { %v1496_v17 = vpop.f32.mrf.mxu0 }
 0x500   : > { %1551 = vst.msk [vmem:[#allocation5 + $0x58] sm:$0xff] %vm646_vm3, %v1535_v7  ;;  %v1533_v57 = vadd.f32 %v1496_v17, %v1412_v14 }
 0x501   : > { %v2057_v5 = vpop.f32.mrf.mxu0 }
 0x502   : > { %1549 = vst.msk [vmem:[#allocation5 + $0x48] sm:$0xff] %vm646_vm3, %v1533_v57  ;;  %v1538_v39 = vadd.f32 %v2057_v5, %v1417_v32 }
 0x503   : > { %v1509_v50 = vpop.f32.mrf.mxu0 }
 0x504   : > { %1554 = vst.msk [vmem:[#allocation5 + $0x70] sm:$0xff] %vm646_vm3, %v1538_v39  ;;  %v1536_v40 = vadd.f32 %v1509_v50, %v1415_v62 }
 0x505   : > { %v2058_v46 = vpop.f32.mrf.mxu0 }
 0x506   : > { %1552 = vst.msk [vmem:[#allocation5 + $0x60] sm:$0xff] %vm646_vm3, %v1536_v40  ;;  %v1539_v33 = vadd.f32 %v2058_v46, %v1418_v61  ;;  %1575 = sbr.rel (%p1933_p10) target bundleno = 1464 (0x5b8), region = 52 }
 0x507   : > { %v1512_v6 = vpop.f32.mrf.mxu0 }
 0x508   : > { %1555 = vst.msk [vmem:[#allocation5 + $0x78] sm:$0xff] %vm646_vm3, %v1539_v33  ;;  %v1537_v41 = vadd.f32 %v1512_v6, %v1416_v49 }
 0x50a   : > { %1553 = vst.msk [vmem:[#allocation5 + $0x68] sm:$0xff] %vm646_vm3, %v1537_v41 }
 0x50b   : > { %v1578_v4 = vld [vmem:[#allocation4 + $0x10] sm:$0xff]  ;;  %v1576_v63 = vld [vmem:[#allocation4] sm:$0xff]  ;;  %v1579_v27 = vld [vmem:[#allocation4 + $0x18] sm:$0xff]  ;;  %v2300_v18 = vmov 0  }
 0x50c   : > { %2208 = vset.pattern.permute.xlu1 %v2300_v18  ;;  %2207 = vset.pattern.permute.xlu0 %v2300_v18  ;;  %2209 = vrcp.f32 %v1578_v4  ;;  %v1577_v9 = vld [vmem:[#allocation4 + $0x8] sm:$0xff]  ;;  %v1580_v12 = vld [vmem:[#allocation4 + $0x20] sm:$0xff]  ;;  %v1583_v56 = vld [vmem:[#allocation4 + $0x38] sm:$0xff] }
 0x50d   : > { %2211 = vrcp.f32 %v1576_v63  ;;  %v1581_v58 = vld [vmem:[#allocation4 + $0x28] sm:$0xff]  ;;  %v1582_v43 = vld [vmem:[#allocation4 + $0x30] sm:$0xff]  ;;  %v1584_v11 = vld [vmem:[#allocation4 + $0x40] sm:$0xff] }
 0x50e   : > { %2213 = vrcp.f32 %v1579_v27  ;;  %v1585_v0 = vld [vmem:[#allocation4 + $0x48] sm:$0xff]  ;;  %v1587_v34 = vld [vmem:[#allocation4 + $0x58] sm:$0xff]  ;;  %v1586_v16 = vld [vmem:[#allocation4 + $0x50] sm:$0xff] }
 0x50f   : > { %2215 = vrcp.f32 %v1577_v9  ;;  %v1589_v37 = vld [vmem:[#allocation4 + $0x68] sm:$0xff]  ;;  %v1588_v36 = vld [vmem:[#allocation4 + $0x60] sm:$0xff]  ;;  %v1591_v60 = vld [vmem:[#allocation4 + $0x78] sm:$0xff] }
 0x510   : > { %2217 = vrcp.f32 %v1581_v58  ;;  %v1590_v2 = vld [vmem:[#allocation4 + $0x70] sm:$0xff]  ;;  %v1608_v22 = vld [vmem:[#allocation5] sm:$0xff]  ;;  %v1611_v53 = vld [vmem:[#allocation5 + $0x18] sm:$0xff] }
 0x511   : > { %2219 = vrcp.f32 %v1580_v12  ;;  %v1610_v21 = vld [vmem:[#allocation5 + $0x10] sm:$0xff]  ;;  %v1720_v54 = vld [vmem:[%s2384_s14] sm:$0xff]  ;;  %v1609_v59 = vld [vmem:[#allocation5 + $0x8] sm:$0xff] }
 0x512   : > { %2221 = vrcp.f32 %v1583_v56  ;;  %v1722_v44 = vld [vmem:[%s2384_s14 + $0x10] sm:$0xff]  ;;  %v1723_v7 = vld [vmem:[%s2384_s14 + $0x18] sm:$0xff]  ;;  %v1721_v32 = vld [vmem:[%s2384_s14 + $0x8] sm:$0xff] }
 0x513   : > { %2223 = vrcp.f32 %v1582_v43  ;;  %v1613_v24 = vld [vmem:[#allocation5 + $0x28] sm:$0xff]  ;;  %v1612_v62 = vld [vmem:[#allocation5 + $0x20] sm:$0xff]  ;;  %v1615_v33 = vld [vmem:[#allocation5 + $0x38] sm:$0xff] }
 0x514   : > { %2225 = vrcp.f32 %v1585_v0  ;;  %v1725_v13 = vld [vmem:[%s2384_s14 + $0x28] sm:$0xff]  ;;  %v1724_v40 = vld [vmem:[%s2384_s14 + $0x20] sm:$0xff]  ;;  %v1614_v41 = vld [vmem:[#allocation5 + $0x30] sm:$0xff] }
 0x515   : > { %2227 = vrcp.f32 %v1584_v11  ;;  %v1727_v63 = vld [vmem:[%s2384_s14 + $0x38] sm:$0xff]  ;;  %v1726_v9 = vld [vmem:[%s2384_s14 + $0x30] sm:$0xff]  ;;  %v1617_v56 = vld [vmem:[#allocation5 + $0x48] sm:$0xff] }
 0x516   : > { %2229 = vrcp.f32 %v1587_v34  ;;  %v1616_v0 = vld [vmem:[#allocation5 + $0x40] sm:$0xff] }
 0x517   : > { %2231 = vrcp.f32 %v1586_v16  ;;  %v1728_v34 = vld [vmem:[%s2384_s14 + $0x40] sm:$0xff] }
 0x518   : > { %2233 = vrcp.f32 %v1589_v37 }
 0x519   : > { %v2210_v30 = vpop.eup %2209  ;;  %2235 = vrcp.f32 %v1588_v36 }
 0x51a   : > { %v2212_v1 = vpop.eup %2211  ;;  %1636 = vperm.xlu1 %2208, %v2210_v30   ;;  %2237 = vrcp.f32 %v1591_v60  ;;  %v1729_v30 = vld [vmem:[%s2384_s14 + $0x48] sm:$0xff] }
 0x51b   : > { %v2214_v31 = vpop.eup %2213  ;;  %1626 = vperm.xlu0 %2207, %v2212_v1   ;;  %2239 = vrcp.f32 %v1590_v2  ;;  %v1730_v2 = vld [vmem:[%s2384_s14 + $0x50] sm:$0xff] }
 0x51c   : > { %v2216_v52 = vpop.eup %2215 }
 0x51d   : > { %v2218_v25 = vpop.eup %2217 }
 0x51e   : > { %1641 = vperm.xlu1 %2208, %v2214_v31   ;;  %v2220_v10 = vpop.eup %2219 }
 0x51f   : > { %1631 = vperm.xlu0 %2207, %v2216_v52   ;;  %v2222_v51 = vpop.eup %2221 }
 0x520   : > { %v2224_v42 = vpop.eup %2223 }
 0x521   : > { %v2226_v45 = vpop.eup %2225 }
 0x522   : > { %1651 = vperm.xlu1 %2208, %v2218_v25   ;;  %v2228_v48 = vpop.eup %2227  ;;  %v1619_v25 = vld [vmem:[#allocation5 + $0x58] sm:$0xff] }
 0x523   : > { %1646 = vperm.xlu0 %2207, %v2220_v10   ;;  %v2230_v47 = vpop.eup %2229  ;;  %v1618_v10 = vld [vmem:[#allocation5 + $0x50] sm:$0xff] }
 0x524   : > { %v2232_v3 = vpop.eup %2231 }
 0x525   : > { %v2234_v23 = vpop.eup %2233 }
 0x526   : > { %1661 = vperm.xlu1 %2208, %v2222_v51   ;;  %v2236_v20 = vpop.eup %2235  ;;  %v1731_v51 = vld [vmem:[%s2384_s14 + $0x58] sm:$0xff] }
 0x527   : > { %1656 = vperm.xlu0 %2207, %v2224_v42   ;;  %v2238_v38 = vpop.eup %2237 }
 0x528   : > { %v2240_v55 = vpop.eup %2239 }
 0x52a   : > { %1671 = vperm.xlu1 %2208, %v2226_v45  }
 0x52b   : > { %1666 = vperm.xlu0 %2207, %v2228_v48  }
 0x52e   : > { %1681 = vperm.xlu1 %2208, %v2230_v47   ;;  %v1621_v47 = vld [vmem:[#allocation5 + $0x68] sm:$0xff] }
 0x52f   : > { %1676 = vperm.xlu0 %2207, %v2232_v3  }
 0x532   : > { %1691 = vperm.xlu1 %2208, %v2234_v23   ;;  %v1620_v23 = vld [vmem:[#allocation5 + $0x60] sm:$0xff] }
 0x533   : > { %1686 = vperm.xlu0 %2207, %v2236_v20  }
 0x536   : > { %1701 = vperm.xlu1 %2208, %v2238_v38   ;;  %v1733_v38 = vld [vmem:[%s2384_s14 + $0x68] sm:$0xff] }
 0x537   : > { %1696 = vperm.xlu0 %2207, %v2240_v55  }
 0x595   : > { %v1637_v26 = vpop.permute.xlu1 %1636 }
 0x596   : > { %v1706_v28 = vmul.f32 %v1637_v26, %v1610_v21  ;;  %v1627_v15 = vpop.permute.xlu0 %1626 }
 0x597   : > { %v1704_v29 = vmul.f32 %v1627_v15, %v1608_v22  ;;  %v1732_v22 = vld [vmem:[%s2384_s14 + $0x60] sm:$0xff]  ;;  %v1622_v15 = vld [vmem:[#allocation5 + $0x70] sm:$0xff] }
 0x598   : > { %v1738_v8 = vadd.f32 %v1722_v44, %v1706_v28  ;;  %v1623_v28 = vld [vmem:[#allocation5 + $0x78] sm:$0xff] }
 0x599   : > { %v1736_v14 = vadd.f32 %v1720_v54, %v1704_v29  ;;  %v1642_v19 = vpop.permute.xlu1 %1641 }
 0x59a   : > { %1754 = vst.msk [vmem:[%s2389_s17 + $0x10] sm:$0xff] %vm646_vm3, %v1738_v8  ;;  %v1707_v17 = vmul.f32 %v1642_v19, %v1611_v53  ;;  %v1632_v57 = vpop.permute.xlu0 %1631  ;;  %v1735_v53 = vld [vmem:[%s2384_s14 + $0x78] sm:$0xff] }
 0x59b   : > { %1752 = vst.msk [vmem:[%s2389_s17] sm:$0xff] %vm646_vm3, %v1736_v14  ;;  %v1705_v35 = vmul.f32 %v1632_v57, %v1609_v59  ;;  %v1734_v14 = vld [vmem:[%s2384_s14 + $0x70] sm:$0xff] }
 0x59c   : > { %v1739_v5 = vadd.f32 %v1723_v7, %v1707_v17 }
 0x59d   : > { %v1737_v39 = vadd.f32 %v1721_v32, %v1705_v35  ;;  %v1652_v50 = vpop.permute.xlu1 %1651 }
 0x59e   : > { %1755 = vst.msk [vmem:[%s2389_s17 + $0x18] sm:$0xff] %vm646_vm3, %v1739_v5  ;;  %v1709_v61 = vmul.f32 %v1652_v50, %v1613_v24  ;;  %v1647_v46 = vpop.permute.xlu0 %1646 }
 0x59f   : > { %1753 = vst.msk [vmem:[%s2389_s17 + $0x8] sm:$0xff] %vm646_vm3, %v1737_v39  ;;  %v1708_v49 = vmul.f32 %v1647_v46, %v1612_v62 }
 0x5a0   : > { %v1741_v6 = vadd.f32 %v1725_v13, %v1709_v61 }
 0x5a1   : > { %v1740_v4 = vadd.f32 %v1724_v40, %v1708_v49  ;;  %v1662_v27 = vpop.permute.xlu1 %1661 }
 0x5a2   : > { %1757 = vst.msk [vmem:[%s2389_s17 + $0x28] sm:$0xff] %vm646_vm3, %v1741_v6  ;;  %v1711_v18 = vmul.f32 %v1662_v27, %v1615_v33  ;;  %v1657_v58 = vpop.permute.xlu0 %1656 }
 0x5a3   : > { %1756 = vst.msk [vmem:[%s2389_s17 + $0x20] sm:$0xff] %vm646_vm3, %v1740_v4  ;;  %v1710_v12 = vmul.f32 %v1657_v58, %v1614_v41 }
 0x5a4   : > { %v1743_v43 = vadd.f32 %v1727_v63, %v1711_v18 }
 0x5a5   : > { %v1742_v11 = vadd.f32 %v1726_v9, %v1710_v12  ;;  %v1672_v1 = vpop.permute.xlu1 %1671 }
 0x5a6   : > { %1759 = vst.msk [vmem:[%s2389_s17 + $0x38] sm:$0xff] %vm646_vm3, %v1743_v43  ;;  %v1713_v31 = vmul.f32 %v1672_v1, %v1617_v56  ;;  %v1667_v52 = vpop.permute.xlu0 %1666 }
 0x5a7   : > { %1758 = vst.msk [vmem:[%s2389_s17 + $0x30] sm:$0xff] %vm646_vm3, %v1742_v11  ;;  %v1712_v16 = vmul.f32 %v1667_v52, %v1616_v0 }
 0x5a8   : > { %v1745_v37 = vadd.f32 %v1729_v30, %v1713_v31 }
 0x5a9   : > { %v1744_v36 = vadd.f32 %v1728_v34, %v1712_v16  ;;  %v1682_v60 = vpop.permute.xlu1 %1681 }
 0x5aa   : > { %1761 = vst.msk [vmem:[%s2389_s17 + $0x48] sm:$0xff] %vm646_vm3, %v1745_v37  ;;  %v1715_v42 = vmul.f32 %v1682_v60, %v1619_v25  ;;  %v1677_v45 = vpop.permute.xlu0 %1676 }
 0x5ab   : > { %1760 = vst.msk [vmem:[%s2389_s17 + $0x40] sm:$0xff] %vm646_vm3, %v1744_v36  ;;  %v1714_v48 = vmul.f32 %v1677_v45, %v1618_v10 }
 0x5ac   : > { %v1747_v3 = vadd.f32 %v1731_v51, %v1715_v42 }
 0x5ad   : > { %v1746_v20 = vadd.f32 %v1730_v2, %v1714_v48  ;;  %v1692_v55 = vpop.permute.xlu1 %1691 }
 0x5ae   : > { %1763 = vst.msk [vmem:[%s2389_s17 + $0x58] sm:$0xff] %vm646_vm3, %v1747_v3  ;;  %v1717_v21 = vmul.f32 %v1692_v55, %v1621_v47  ;;  %v1687_v44 = vpop.permute.xlu0 %1686 }
 0x5af   : > { %1762 = vst.msk [vmem:[%s2389_s17 + $0x50] sm:$0xff] %vm646_vm3, %v1746_v20  ;;  %v1716_v26 = vmul.f32 %v1687_v44, %v1620_v23 }
 0x5b0   : > { %v1749_v54 = vadd.f32 %v1733_v38, %v1717_v21 }
 0x5b1   : > { %v1748_v29 = vadd.f32 %v1732_v22, %v1716_v26  ;;  %v1702_v8 = vpop.permute.xlu1 %1701 }
 0x5b2   : > { %1765 = vst.msk [vmem:[%s2389_s17 + $0x68] sm:$0xff] %vm646_vm3, %v1749_v54  ;;  %v1719_v59 = vmul.f32 %v1702_v8, %v1623_v28  ;;  %v1697_v7 = vpop.permute.xlu0 %1696 }
 0x5b3   : > { %1764 = vst.msk [vmem:[%s2389_s17 + $0x60] sm:$0xff] %vm646_vm3, %v1748_v29  ;;  %v1718_v19 = vmul.f32 %v1697_v7, %v1622_v15 }
 0x5b4   : > { %v1751_v17 = vadd.f32 %v1735_v53, %v1719_v59 }
 0x5b5   : > { %v1750_v32 = vadd.f32 %v1734_v14, %v1718_v19 }
 0x5b6   : > { %1767 = vst.msk [vmem:[%s2389_s17 + $0x78] sm:$0xff] %vm646_vm3, %v1751_v17 }
 0x5b7   : > { %1766 = vst.msk [vmem:[%s2389_s17 + $0x70] sm:$0xff] %vm646_vm3, %v1750_v32 }
 0x5b8 PF: > { %s16_s27 = sadd.s32 1, %s2295_s27   ;;  %s3003_s21 = smov %s2283_s24 }
 0x5b9   : > { %p13_p11 = scmp.ge.s32.totalorder %s16_s27, 10   ;;  %s3004_s22 = smov %s2287_s25 }
 0x5ba   : > { %s3005_s23 = smov %s2291_s26  ;;  %s3006_s24 = smov %s3010_s28 }
 0x5bb   : > { %s3007_s25 = smov %s3014_s29  ;;  %s3008_s26 = smov %s3018_s30 }
 0x5bc   :  { %15 = sbr.rel (!%p13_p11) target bundleno = 4 (0x4), region = 85 }

</bundles_post_ra>
